<compile_context>
chip_gen: v7x
topology: tpu7x:2x2x1
jax: 0.10.0
libtpu: 0.0.40
codegen_flags: <defaults>
</compile_context>

<pallas_src>
import jax
import jax.numpy as jnp
from jax import lax
from jax.experimental import pallas as pl
from jax.experimental.pallas import tpu as pltpu


# ----------------------------------------------------------------------------- #
# Kernel: three fused bf16 GEMMs (+ f32 bias / PReLU) over a (TB, ...) batch tile
# ----------------------------------------------------------------------------- #
def _embedding_net_kernel(alphas_ref,                 # SMEM (3,) f32  PReLU alphas
                          x_ref,                      # VMEM (TB, C0*L) f32
                          w1_ref, b1_ref,             # (C0*L, L1*C1) bf16 / (1, L1*C1) f32
                          w2_ref, b2_ref,             # (L1*C1, L2*C2) bf16 / (1, L2*C2) f32
                          w3_ref, b3_ref,             # (L2*C2, C3*L3) bf16 / (1, C3*L3) f32
                          o_ref):                     # VMEM (TB, C3*L3) f32

    def stage(h_f32, w_ref, b_ref, alpha):
        # One bf16 x bf16 -> f32 MXU GEMM per layer (single activation cast),
        # bias + PReLU epilogue kept in f32 on the VPU (v5e has no bf16 VALU/EUP).
        acc = jnp.dot(h_f32.astype(jnp.bfloat16), w_ref[...],
                      preferred_element_type=jnp.float32)
        acc = acc + b_ref[...]
        return jnp.maximum(acc, 0.0) + alpha * jnp.minimum(acc, 0.0)

    h = stage(x_ref[...], w1_ref, b1_ref, alphas_ref[0])   # conv1+BN1+PReLU1
    h = stage(h,          w2_ref, b2_ref, alphas_ref[1])   # pool1+conv2+BN2+PReLU2
    h = stage(h,          w3_ref, b3_ref, alphas_ref[2])   # pool2+conv3+BN3+PReLU3 (+flatten)
    o_ref[...] = h.astype(o_ref.dtype)


# ----------------------------------------------------------------------------- #
# Offline packing: fold Conv1d + BatchNorm1d(eval) + AvgPool1d + flatten into
# dense per-stage matrices (plain JAX, runs once outside the kernel).
# ----------------------------------------------------------------------------- #
def _conv_matrix(w_f, l_in, chan_major_rows):
    """Dense matrix of a 'valid' Conv1d on a flattened activation vector.

    w_f: (K, Cin, Cout) BN-folded weights.
    Rows: c*l_in + t (channel-major) if chan_major_rows else t*Cin + c (position-major).
    Cols: l*Cout + d (position-major).
    """
    k, cin, cout = w_f.shape
    l_out = l_in - (k - 1)
    assert l_out > 0, "sequence too short for this conv stack"
    t = jnp.arange(l_in)[:, None, None]
    l = jnp.arange(l_out)[None, :, None]
    taps = jnp.arange(k)[None, None, :]
    sel = (t - l == taps).astype(jnp.float32)                 # (l_in, l_out, K)
    if chan_major_rows:
        m = jnp.einsum('tlk,kcd->ctld', sel, w_f)             # rows (c, t)
    else:
        m = jnp.einsum('tlk,kcd->tcld', sel, w_f)             # rows (t, c)
    return m.reshape(l_in * cin, l_out * cout)


def _avgpool_matrix(l_in, channels):
    """Dense matrix of AvgPool1d(2, stride=2) on position-major flat activations."""
    p_out = l_in // 2
    t = jnp.arange(l_in)[:, None]
    p = jnp.arange(p_out)[None, :]
    sel = 0.5 * (t // 2 == p).astype(jnp.float32)             # (l_in, p_out)
    eye = jnp.eye(channels, dtype=jnp.float32)
    return jnp.einsum('tp,ce->tcpe', sel, eye).reshape(l_in * channels,
                                                       p_out * channels)


def pack_embedding_net_params(layers, seq_len, eps=1e-5):
    """layers[i] = (conv_w (Cout,Cin,K), conv_b, bn_gamma, bn_beta, bn_mean, bn_var,
    prelu_alpha (1,)).  Returns (mats bf16, bias rows f32, alphas (3,) f32)."""
    n = len(layers)
    mats, biases, alphas = [], [], []
    pos = seq_len                                   # spatial length entering the stage
    for i, (w, b, gamma, beta, mean, var, alpha) in enumerate(layers):
        cout, cin, k = w.shape
        s = gamma / jnp.sqrt(var + eps)             # eval-mode BatchNorm fold
        w_f = jnp.transpose(w, (2, 1, 0)) * s[None, None, :]    # (K, Cin, Cout)
        b_f = (b - mean) * s + beta                              # (Cout,)
        if i == 0:
            conv_in = pos
            mat = _conv_matrix(w_f, conv_in, chan_major_rows=True)
        else:
            # AvgPool1d(2,2) sits between the previous PReLU and this conv; it is
            # linear, so fold it into this stage's matrix (semantics preserved).
            conv_in = pos // 2
            mat = _avgpool_matrix(pos, cin) @ _conv_matrix(w_f, conv_in,
                                                           chan_major_rows=False)
        l_out = conv_in - (k - 1)
        vec = jnp.tile(b_f, l_out)                               # cols l*Cout + d
        if i == n - 1:
            # Final .view(B, -1) flattens (B, C, L) channel-major -> permute columns.
            rows = mat.shape[0]
            mat = mat.reshape(rows, l_out, cout).transpose(0, 2, 1).reshape(
                rows, cout * l_out)
            vec = vec.reshape(l_out, cout).T.reshape(-1)
        mats.append(mat.astype(jnp.bfloat16))
        biases.append(vec.reshape(1, -1).astype(jnp.float32))
        alphas.append(jnp.reshape(alpha, ()).astype(jnp.float32))
        pos = l_out
    return tuple(mats), tuple(biases), jnp.stack(alphas)


# ----------------------------------------------------------------------------- #
# Wrapper
# ----------------------------------------------------------------------------- #
def _choose_batch_tile(batch):
    # >= 8 sublanes per tile, <= 128 rows (one full MXU pass), and >= 2 grid steps
    # once the batch is large enough so v7x megacore has independent work to split.
    tb = pl.next_power_of_2(max(1, batch // 2))
    return int(max(8, min(128, tb)))


def embedding_net_forward(x_ncw, packed):
    """EmbeddingNet.forward / get_embedding: x (B, C_in, L) -> (B, 16 * L3)."""
    mats, biases, alphas = packed
    B, C0, L = x_ncw.shape
    E = mats[2].shape[1]
    assert mats[0].shape[0] == C0 * L, "packed params do not match input shape"

    TB = _choose_batch_tile(B)
    n_blk = pl.cdiv(B, TB)
    b_pad = n_blk * TB

    # Free reshape (contiguous collapse) of the NCW tensor: channel-major flat input.
    x_flat = x_ncw.astype(jnp.float32).reshape(B, C0 * L)
    if b_pad != B:
        x_flat = jnp.pad(x_flat, ((0, b_pad - B), (0, 0)))

    out = pl.pallas_call(
        _embedding_net_kernel,
        out_shape=jax.ShapeDtypeStruct((b_pad, E), jnp.float32),
        grid_spec=pl.GridSpec(
            grid=(n_blk,),
            in_specs=[
                pl.BlockSpec(memory_space=pltpu.MemorySpace.SMEM),     # PReLU alphas
                pl.BlockSpec((TB, C0 * L), lambda i: (i, 0)),          # batch tile of x
                pl.BlockSpec(mats[0].shape, lambda i: (0, 0)),         # stage-1 weights
                pl.BlockSpec(biases[0].shape, lambda i: (0, 0)),
                pl.BlockSpec(mats[1].shape, lambda i: (0, 0)),         # stage-2 weights
                pl.BlockSpec(biases[1].shape, lambda i: (0, 0)),
                pl.BlockSpec(mats[2].shape, lambda i: (0, 0)),         # stage-3 weights
                pl.BlockSpec(biases[2].shape, lambda i: (0, 0)),
            ],
            out_specs=pl.BlockSpec((TB, E), lambda i: (i, 0)),
        ),
        compiler_params=pltpu.CompilerParams(
            dimension_semantics=("parallel",),      # independent batch tiles
        ),
    )(alphas, x_flat, mats[0], biases[0], mats[1], biases[1], mats[2], biases[2])

    return out[:B]


# ----------------------------------------------------------------------------- #
# Synthetic parameters (PyTorch-style Conv1d / BatchNorm1d / PReLU per stage)
# ----------------------------------------------------------------------------- #
def init_embedding_net_params(key, c_in, k_taps=4):
    chans = [c_in, 64, 32, 16]
    keys = iter(jax.random.split(key, 18))
    layers = []
    for i in range(3):
        cin, cout = chans[i], chans[i + 1]
        w = jax.random.normal(next(keys), (cout, cin, k_taps), jnp.float32)
        w = w / jnp.sqrt(float(cin * k_taps))
        b = 0.1 * jax.random.normal(next(keys), (cout,), jnp.float32)
        gamma = 1.0 + 0.1 * jax.random.normal(next(keys), (cout,), jnp.float32)
        beta = 0.1 * jax.random.normal(next(keys), (cout,), jnp.float32)
        mean = 0.1 * jax.random.normal(next(keys), (cout,), jnp.float32)
        var = 1.0 + 0.1 * jax.random.uniform(next(keys), (cout,), jnp.float32)
        alpha = jnp.full((1,), 0.25, jnp.float32)       # nn.PReLU() default
        layers.append((w, b, gamma, beta, mean, var, alpha))
    return layers


# ----------------------------------------------------------------------------- #
# Module-faithful plain-JAX / f32 reference (Conv1d, eval BN, PReLU, AvgPool, flatten)
# ----------------------------------------------------------------------------- #
def embedding_net_reference(x_ncw, layers, eps=1e-5):
    h = x_ncw.astype(jnp.float32)
    n = len(layers)
    for i, (w, b, gamma, beta, mean, var, alpha) in enumerate(layers):
        h = lax.conv_general_dilated(h, w, window_strides=(1,), padding='VALID',
                                     dimension_numbers=('NCH', 'OIH', 'NCH'))
        h = h + b[None, :, None]
        scale = (gamma / jnp.sqrt(var + eps))[None, :, None]
        h = (h - mean[None, :, None]) * scale + beta[None, :, None]
        a = alpha.reshape(())
        h = jnp.where(h >= 0, h, a * h)
        if i < n - 1:
            p = h.shape[2] // 2
            h = 0.5 * (h[:, :, 0:2 * p:2] + h[:, :, 1:2 * p:2])
    return h.reshape(h.shape[0], -1)


if __name__ == "__main__":
    key = jax.random.PRNGKey(0)
    kx, kp = jax.random.split(key)

    # Small shapes: batch=2, input_embedding_size (channels)=4, sequence length=32.
    B, C_IN, L = 2, 4, 32
    x = jax.random.normal(kx, (B, C_IN, L), jnp.float32)

    layers = init_embedding_net_params(kp, C_IN)
    packed = pack_embedding_net_params(layers, L)

    fwd = jax.jit(embedding_net_forward)
    out = fwd(x, packed)
    jax.block_until_ready(out)

    ref = embedding_net_reference(x, layers)
    assert out.shape == ref.shape == (B, 32), (out.shape, ref.shape)
    max_err = float(jnp.max(jnp.abs(out - ref)))
    # bf16 weight/activation quantization inside the kernel vs. pure-f32 reference.
    assert jnp.allclose(out, ref, atol=2e-2, rtol=2e-2), max_err

    print("KERNEL_OK")
</pallas_src>

<mosaic_0001>
module attributes {stable_mosaic.version = 11 : i64} {
  func.func @_embedding_net_kernel(%arg0: i32, %arg1: memref<3xf32, #tpu.memory_space<smem>>, %arg2: memref<8x128xf32, #tpu.memory_space<vmem>>, %arg3: memref<128x1856xbf16, #tpu.memory_space<vmem>>, %arg4: memref<1x1856xf32, #tpu.memory_space<vmem>>, %arg5: memref<1856x352xbf16, #tpu.memory_space<vmem>>, %arg6: memref<1x352xf32, #tpu.memory_space<vmem>>, %arg7: memref<352x32xbf16, #tpu.memory_space<vmem>>, %arg8: memref<1x32xf32, #tpu.memory_space<vmem>>, %arg9: memref<8x32xf32, #tpu.memory_space<vmem>>) attributes {dimension_semantics = [#tpu.dimension_semantics<parallel>], iteration_bounds = array<i64: 1>, scalar_prefetch = 0 : i64, scratch_operands = 0 : i64, tpu.core_type = #tpu.core_type<tc>, window_params = [{transform_indices = @transform_0, window_bounds = array<i64: 3>}, {transform_indices = @transform_1, window_bounds = array<i64: 8, 128>}, {pipeline_mode = #tpu.pipeline_mode<synchronous>, transform_indices = @transform_2, window_bounds = array<i64: 128, 1856>}, {pipeline_mode = #tpu.pipeline_mode<synchronous>, transform_indices = @transform_3, window_bounds = array<i64: 1, 1856>}, {pipeline_mode = #tpu.pipeline_mode<synchronous>, transform_indices = @transform_4, window_bounds = array<i64: 1856, 352>}, {pipeline_mode = #tpu.pipeline_mode<synchronous>, transform_indices = @transform_5, window_bounds = array<i64: 1, 352>}, {pipeline_mode = #tpu.pipeline_mode<synchronous>, transform_indices = @transform_6, window_bounds = array<i64: 352, 32>}, {pipeline_mode = #tpu.pipeline_mode<synchronous>, transform_indices = @transform_7, window_bounds = array<i64: 1, 32>}, {transform_indices = @transform_8, window_bounds = array<i64: 8, 32>}]} {
    %c0 = arith.constant 0 : index
    %c0_0 = arith.constant 0 : index
    %0 = vector.load %arg2[%c0, %c0_0] : memref<8x128xf32, #tpu.memory_space<vmem>>, vector<8x128xf32>
    %c0_1 = arith.constant 0 : index
    %1 = memref.load %arg1[%c0_1] : memref<3xf32, #tpu.memory_space<smem>>
    %2 = arith.truncf %0 : vector<8x128xf32> to vector<8x128xbf16>
    %c0_2 = arith.constant 0 : index
    %c0_3 = arith.constant 0 : index
    %3 = vector.load %arg3[%c0_2, %c0_3] : memref<128x1856xbf16, #tpu.memory_space<vmem>>, vector<128x1856xbf16>
    %cst = arith.constant dense<0.000000e+00> : vector<8x1856xf32>
    %4 = tpu.matmul %2, %3, %cst {dimension_numbers = #tpu.dot_dimension_numbers<[1], [0], [0], [1], [0, 0, 1, 1], [], []>} : vector<8x128xbf16>, vector<128x1856xbf16>, vector<8x1856xf32> -> vector<8x1856xf32>
    %c0_4 = arith.constant 0 : index
    %c0_5 = arith.constant 0 : index
    %5 = vector.load %arg4[%c0_4, %c0_5] : memref<1x1856xf32, #tpu.memory_space<vmem>>, vector<1x1856xf32>
    %6 = vector.broadcast %5 : vector<1x1856xf32> to vector<8x1856xf32>
    %7 = arith.addf %4, %6 : vector<8x1856xf32>
    %cst_6 = arith.constant 0.000000e+00 : f32
    %8 = vector.broadcast %cst_6 : f32 to vector<8x1856xf32>
    %9 = arith.maximumf %7, %8 : vector<8x1856xf32>
    %cst_7 = arith.constant 0.000000e+00 : f32
    %10 = vector.broadcast %cst_7 : f32 to vector<8x1856xf32>
    %11 = arith.minimumf %7, %10 : vector<8x1856xf32>
    %12 = vector.broadcast %1 : f32 to vector<8x1856xf32>
    %13 = arith.mulf %12, %11 : vector<8x1856xf32>
    %14 = arith.addf %9, %13 : vector<8x1856xf32>
    %c1 = arith.constant 1 : index
    %15 = memref.load %arg1[%c1] : memref<3xf32, #tpu.memory_space<smem>>
    %16 = arith.truncf %14 : vector<8x1856xf32> to vector<8x1856xbf16>
    %c0_8 = arith.constant 0 : index
    %c0_9 = arith.constant 0 : index
    %17 = vector.load %arg5[%c0_8, %c0_9] : memref<1856x352xbf16, #tpu.memory_space<vmem>>, vector<1856x352xbf16>
    %cst_10 = arith.constant dense<0.000000e+00> : vector<8x352xf32>
    %18 = tpu.matmul %16, %17, %cst_10 {dimension_numbers = #tpu.dot_dimension_numbers<[1], [0], [0], [1], [0, 0, 1, 1], [], []>} : vector<8x1856xbf16>, vector<1856x352xbf16>, vector<8x352xf32> -> vector<8x352xf32>
    %c0_11 = arith.constant 0 : index
    %c0_12 = arith.constant 0 : index
    %19 = vector.load %arg6[%c0_11, %c0_12] : memref<1x352xf32, #tpu.memory_space<vmem>>, vector<1x352xf32>
    %20 = vector.broadcast %19 : vector<1x352xf32> to vector<8x352xf32>
    %21 = arith.addf %18, %20 : vector<8x352xf32>
    %cst_13 = arith.constant 0.000000e+00 : f32
    %22 = vector.broadcast %cst_13 : f32 to vector<8x352xf32>
    %23 = arith.maximumf %21, %22 : vector<8x352xf32>
    %cst_14 = arith.constant 0.000000e+00 : f32
    %24 = vector.broadcast %cst_14 : f32 to vector<8x352xf32>
    %25 = arith.minimumf %21, %24 : vector<8x352xf32>
    %26 = vector.broadcast %15 : f32 to vector<8x352xf32>
    %27 = arith.mulf %26, %25 : vector<8x352xf32>
    %28 = arith.addf %23, %27 : vector<8x352xf32>
    %c2 = arith.constant 2 : index
    %29 = memref.load %arg1[%c2] : memref<3xf32, #tpu.memory_space<smem>>
    %30 = arith.truncf %28 : vector<8x352xf32> to vector<8x352xbf16>
    %c0_15 = arith.constant 0 : index
    %c0_16 = arith.constant 0 : index
    %31 = vector.load %arg7[%c0_15, %c0_16] : memref<352x32xbf16, #tpu.memory_space<vmem>>, vector<352x32xbf16>
    %cst_17 = arith.constant dense<0.000000e+00> : vector<8x32xf32>
    %32 = tpu.matmul %30, %31, %cst_17 {dimension_numbers = #tpu.dot_dimension_numbers<[1], [0], [0], [1], [0, 0, 1, 1], [], []>} : vector<8x352xbf16>, vector<352x32xbf16>, vector<8x32xf32> -> vector<8x32xf32>
    %c0_18 = arith.constant 0 : index
    %c0_19 = arith.constant 0 : index
    %33 = vector.load %arg8[%c0_18, %c0_19] : memref<1x32xf32, #tpu.memory_space<vmem>>, vector<1x32xf32>
    %34 = vector.broadcast %33 : vector<1x32xf32> to vector<8x32xf32>
    %35 = arith.addf %32, %34 : vector<8x32xf32>
    %cst_20 = arith.constant 0.000000e+00 : f32
    %36 = vector.broadcast %cst_20 : f32 to vector<8x32xf32>
    %37 = arith.maximumf %35, %36 : vector<8x32xf32>
    %cst_21 = arith.constant 0.000000e+00 : f32
    %38 = vector.broadcast %cst_21 : f32 to vector<8x32xf32>
    %39 = arith.minimumf %35, %38 : vector<8x32xf32>
    %40 = vector.broadcast %29 : f32 to vector<8x32xf32>
    %41 = arith.mulf %40, %39 : vector<8x32xf32>
    %42 = arith.addf %37, %41 : vector<8x32xf32>
    %c0_22 = arith.constant 0 : index
    %c0_23 = arith.constant 0 : index
    %43 = vector.load %arg9[%c0_22, %c0_23] : memref<8x32xf32, #tpu.memory_space<vmem>>, vector<8x32xf32>
    tpu.vector_store %arg9[%c0_22, %c0_23], %42 {strides = array<i32>} : memref<8x32xf32, #tpu.memory_space<vmem>>, vector<8x32xf32>,
    return
  }
  func.func @transform_0(%arg0: i32) -> i32 {
    %c0_i32 = arith.constant 0 : i32
    %c0_i32_0 = arith.constant 0 : i32
    return %c0_i32 : i32
  }
  func.func @transform_1(%arg0: i32) -> (i32, i32) {
    %c0_i32 = arith.constant 0 : i32
    %c0_i32_0 = arith.constant 0 : i32
    return %arg0, %c0_i32 : i32, i32
  }
  func.func @transform_2(%arg0: i32) -> (i32, i32) {
    %c0_i32 = arith.constant 0 : i32
    %c0_i32_0 = arith.constant 0 : i32
    %c0_i32_1 = arith.constant 0 : i32
    return %c0_i32, %c0_i32_0 : i32, i32
  }
  func.func @transform_3(%arg0: i32) -> (i32, i32) {
    %c0_i32 = arith.constant 0 : i32
    %c0_i32_0 = arith.constant 0 : i32
    %c0_i32_1 = arith.constant 0 : i32
    return %c0_i32, %c0_i32_0 : i32, i32
  }
  func.func @transform_4(%arg0: i32) -> (i32, i32) {
    %c0_i32 = arith.constant 0 : i32
    %c0_i32_0 = arith.constant 0 : i32
    %c0_i32_1 = arith.constant 0 : i32
    return %c0_i32, %c0_i32_0 : i32, i32
  }
  func.func @transform_5(%arg0: i32) -> (i32, i32) {
    %c0_i32 = arith.constant 0 : i32
    %c0_i32_0 = arith.constant 0 : i32
    %c0_i32_1 = arith.constant 0 : i32
    return %c0_i32, %c0_i32_0 : i32, i32
  }
  func.func @transform_6(%arg0: i32) -> (i32, i32) {
    %c0_i32 = arith.constant 0 : i32
    %c0_i32_0 = arith.constant 0 : i32
    %c0_i32_1 = arith.constant 0 : i32
    return %c0_i32, %c0_i32_0 : i32, i32
  }
  func.func @transform_7(%arg0: i32) -> (i32, i32) {
    %c0_i32 = arith.constant 0 : i32
    %c0_i32_0 = arith.constant 0 : i32
    %c0_i32_1 = arith.constant 0 : i32
    return %c0_i32, %c0_i32_0 : i32, i32
  }
  func.func @transform_8(%arg0: i32) -> (i32, i32) {
    %c0_i32 = arith.constant 0 : i32
    %c0_i32_0 = arith.constant 0 : i32
    return %arg0, %c0_i32 : i32, i32
  }
}

</mosaic_0001>

<bundles_post_ra>
// kernel: embedding_net_forward.1
= control target key start
LH: loop header
LB: loop body
LE: loop exit
PB: predicated region body
PF: predicated region fallthrough
CT: control target
= control target key end

     0   :  { %13 = vsyncpa [#allocation3], 0  ;;  %s7752_s0 = inlined_call_operand.vmem [shape: f32[3], index: 0, kind: input, shape index: {}]   ;;  %s7753_s1 = inlined_call_operand.vmem [shape: f32[8,128], index: 1, kind: input, shape index: {}]   ;;  %s7754_s2 = inlined_call_operand.vmem [shape: bf16[128,1856], index: 2, kind: input, shape index: {}]   ;;  %s7755_s3 = inlined_call_operand.vmem [shape: f32[1,1856], index: 3, kind: input, shape index: {}]   ;;  %s7756_s4 = inlined_call_operand.vmem [shape: bf16[1856,352], index: 4, kind: input, shape index: {}]   ;;  %s7757_s5 = inlined_call_operand.vmem [shape: f32[1,352], index: 5, kind: input, shape index: {}]   ;;  %s7758_s6 = inlined_call_operand.vmem [shape: bf16[352,32], index: 6, kind: input, shape index: {}]   ;;  %s7759_s7 = inlined_call_operand.vmem [shape: f32[1,32], index: 7, kind: input, shape index: {}]   ;;  %s7760_s8 = inlined_call_operand.vmem [shape: f32[8,32], index: 8, kind: output, shape index: {}]  }
   0x1   :  { %s20_s29 = sshll.u32 %s7752_s0, 4  ;;  %s21_s29 = int_to_ptr.vmem [resolvable:$true] %s20_s29 }
   0x2   :  { %s5983_s30 = scalar_lea.vmem %s21_s29, 16  ;;  %p5988_p1 = scmp.lt.s32.totalorder %s21_s29, %s21_s29 }
   0x3   :  { %p5984_p0 = scmp.ne.s32.totalorder %s21_s29, %s5983_s30  ;;  %p5989_p2 = scmp.lt.s32.totalorder %s5983_s30, %s5983_s30 }
   0x5   :  { %p5990_p3 = por %p5989_p2, %p5988_p1 }
   0x7   :  { %p5991_p4 = pnand %p5990_p3, %p5984_p0 }
   0x9   :  { %5994 = shalt.err (!%p5991_p4)
}
   0xa   :  { %s5997_s9 = smov [#allocation2]  }
   0xb   :  { %23 = dma.vmem_to_smem %s21_s29, 16, %s5997_s9, [#allocation3]  }
   0xc   :  { %5995 = dma.done.wait [#allocation3], 16  }
   0xd   :  { %5996 = vsyncadd [#allocation3], 4294967280 }
   0xe   :  { %41 = sfence }
   0xf   :  { %v5321_v0 = vld [vmem:[%s7754_s2 + $0xc] ss:$60 sps:$4 sm:$0xff]   ;;  %v5998_v2 = vmov 0   ;;  %v5324_v3 = vld [vmem:[%s7754_s2 + $0x84] ss:$60 sps:$4 sm:$0xff]   ;;  %vm6000_vm0 = vmmov 0  }
  0x10   :  { %v5323_v1 = vld [vmem:[%s7754_s2 + $0x8] ss:$60 sps:$4 sm:$0xff]   ;;  %934 = vmatprep.mubr.bf16.mxu1 %v5998_v2  ;;  %893 = vmatprep.mubr.bf16.mxu0 %v5998_v2  ;;  %v5326_v4 = vld [vmem:[%s7754_s2 + $0x80] ss:$60 sps:$4 sm:$0xff]   ;;  %v5329_v6 = vld [vmem:[%s7754_s2 + $0xf8] ss:$60 sps:$4 sm:$0xff]  }
  0x11   :  { %902 = vmatprep.subr.bf16.mxu1 %v5321_v0  ;;  %v5327_v5 = vld [vmem:[%s7754_s2 + $0xfc] ss:$60 sps:$4 sm:$0xff]   ;;  %v5330_v7 = vld [vmem:[%s7754_s2 + $0x174] ss:$60 sps:$4 sm:$0xff]   ;;  %v5342_v8 = vld [vmem:[%s7754_s2 + $0x4] ss:$60 sps:$4 sm:$0xff]  }
  0x12   :  { %903 = vmatpush1.bf16.msra.mxu1 %v5323_v1  ;;  %v5344_v9 = vld [vmem:[%s7754_s2] ss:$60 sps:$4 sm:$0xff]   ;;  %v5332_v10 = vld [vmem:[%s7754_s2 + $0x170] ss:$60 sps:$4 sm:$0xff]   ;;  %861 = vmatprep.subr.bf16.mxu0 %v5342_v8  ;;  %v5350_v13 = vld [vmem:[%s7754_s2 + $0x78] ss:$60 sps:$4 sm:$0xff]  }
  0x13   :  { %904 = vmatprep.subr.bf16.mxu1 %v5324_v3  ;;  %v5333_v11 = vld [vmem:[%s7754_s2 + $0x1ec] ss:$60 sps:$4 sm:$0xff]   ;;  %v5348_v12 = vld [vmem:[%s7754_s2 + $0x7c] ss:$60 sps:$4 sm:$0xff]   ;;  %862 = vmatpush1.bf16.msra.mxu0 %v5344_v9  ;;  %v5354_v15 = vld [vmem:[%s7754_s2 + $0xf4] ss:$60 sps:$4 sm:$0xff]  }
  0x14   :  { %v5335_v14 = vld [vmem:[%s7754_s2 + $0x1e8] ss:$60 sps:$4 sm:$0xff]   ;;  %863 = vmatprep.subr.bf16.mxu0 %v5348_v12  ;;  %v5356_v17 = vld [vmem:[%s7754_s2 + $0xf0] ss:$60 sps:$4 sm:$0xff]   ;;  %v5338_v19 = vld [vmem:[%s7754_s2 + $0x260] ss:$60 sps:$4 sm:$0xff]  }
  0x15   :  { %v5336_v16 = vld [vmem:[%s7754_s2 + $0x264] ss:$60 sps:$4 sm:$0xff]   ;;  %v5360_v18 = vld [vmem:[%s7754_s2 + $0x16c] ss:$60 sps:$4 sm:$0xff]   ;;  %v5339_v20 = vld [vmem:[%s7754_s2 + $0x2dc] ss:$60 sps:$4 sm:$0xff]  }
  0x16   :  { %905 = vmatpush1.bf16.msra.mxu1 %v5326_v4  ;;  %v5362_v21 = vld [vmem:[%s7754_s2 + $0x168] ss:$60 sps:$4 sm:$0xff]   ;;  %v5341_v23 = vld [vmem:[%s7754_s2 + $0x2d8] ss:$60 sps:$4 sm:$0xff]   ;;  %v5368_v25 = vld [vmem:[%s7754_s2 + $0x1e0] ss:$60 sps:$4 sm:$0xff]  }
  0x17   :  { %906 = vmatprep.subr.bf16.mxu1 %v5327_v5  ;;  %864 = vmatpush1.bf16.msra.mxu0 %v5350_v13  ;;  %v5366_v22 = vld [vmem:[%s7754_s2 + $0x1e4] ss:$60 sps:$4 sm:$0xff]   ;;  %v5345_v24 = vld [vmem:[%s7754_s2 + $0x354] ss:$60 sps:$4 sm:$0xff]   ;;  %v5372_v27 = vld [vmem:[%s7754_s2 + $0x25c] ss:$60 sps:$4 sm:$0xff]  }
  0x18   :  { %865 = vmatprep.subr.bf16.mxu0 %v5354_v15  ;;  %v5347_v26 = vld [vmem:[%s7754_s2 + $0x350] ss:$60 sps:$4 sm:$0xff]   ;;  %v43_v28 = vld [vmem:[%s7753_s1] sm:$0xff]  ;;  %v5353_v29 = vld [vmem:[%s7754_s2 + $0x1c] ss:$60 sps:$4 sm:$0xff]   ;;  %s44_s20 = sld [smem:[#allocation2]] }
  0x19   :  { %v5374_v30 = vld [vmem:[%s7754_s2 + $0x258] ss:$60 sps:$4 sm:$0xff]   ;;  %v6141_v31 = vpack.c.bf16 %v43_v28, %v43_v28  ;;  %v5380_v35 = vld [vmem:[%s7754_s2 + $0x2d0] ss:$60 sps:$4 sm:$0xff]   ;;  %v5386_v39 = vld [vmem:[%s7754_s2 + $0x348] ss:$60 sps:$4 sm:$0xff]  }
  0x1a   :  { %907 = vmatpush1.bf16.msra.mxu1 %v5329_v6  ;;  %v5378_v32 = vld [vmem:[%s7754_s2 + $0x2d4] ss:$60 sps:$4 sm:$0xff]   ;;  %v5384_v36 = vld [vmem:[%s7754_s2 + $0x34c] ss:$60 sps:$4 sm:$0xff]   ;;  %v5371_v42 = vld [vmem:[%s7754_s2 + $0x184] ss:$60 sps:$4 sm:$0xff]  }
  0x1b   :  { %908 = vmatprep.subr.bf16.mxu1 %v5330_v7  ;;  %866 = vmatpush1.bf16.msra.mxu0 %v5356_v17  ;;  %v5351_v33 = vld [vmem:[%s7754_s2 + $0x18] ss:$60 sps:$4 sm:$0xff]   ;;  %v5357_v37 = vld [vmem:[%s7754_s2 + $0x90] ss:$60 sps:$4 sm:$0xff]   ;;  %v5363_v41 = vld [vmem:[%s7754_s2 + $0x108] ss:$60 sps:$4 sm:$0xff]  }
  0x1c   :  { %867 = vmatprep.subr.bf16.mxu0 %v5360_v18  ;;  %v5359_v34 = vld [vmem:[%s7754_s2 + $0x94] ss:$60 sps:$4 sm:$0xff]   ;;  %v5365_v38 = vld [vmem:[%s7754_s2 + $0x10c] ss:$60 sps:$4 sm:$0xff]   ;;  %v5369_v45 = vld [vmem:[%s7754_s2 + $0x180] ss:$60 sps:$4 sm:$0xff]  }
  0x1d   :  { %v5395_v40 = vld [vmem:[%s7754_s2 + $0x14] ss:$60 sps:$4 sm:$0xff]   ;;  %v5401_v44 = vld [vmem:[%s7754_s2 + $0x8c] ss:$60 sps:$4 sm:$0xff]   ;;  %v5377_v46 = vld [vmem:[%s7754_s2 + $0x1fc] ss:$60 sps:$4 sm:$0xff]  }
  0x1e   :  { %909 = vmatpush1.bf16.msra.mxu1 %v5332_v10  ;;  %v5393_v43 = vld [vmem:[%s7754_s2 + $0x10] ss:$60 sps:$4 sm:$0xff]   ;;  %v5399_v47 = vld [vmem:[%s7754_s2 + $0x88] ss:$60 sps:$4 sm:$0xff]   ;;  %v5375_v49 = vld [vmem:[%s7754_s2 + $0x1f8] ss:$60 sps:$4 sm:$0xff]  }
  0x1f   :  { %910 = vmatprep.subr.bf16.mxu1 %v5333_v11  ;;  %868 = vmatpush1.bf16.msra.mxu0 %v5362_v21  ;;  %v5407_v48 = vld [vmem:[%s7754_s2 + $0x104] ss:$60 sps:$4 sm:$0xff]   ;;  %v5383_v50 = vld [vmem:[%s7754_s2 + $0x274] ss:$60 sps:$4 sm:$0xff]   ;;  %v5413_v52 = vld [vmem:[%s7754_s2 + $0x17c] ss:$60 sps:$4 sm:$0xff]  }
  0x20   :  { %869 = vmatprep.subr.bf16.mxu0 %v5366_v22  ;;  %v5405_v51 = vld [vmem:[%s7754_s2 + $0x100] ss:$60 sps:$4 sm:$0xff]   ;;  %v5381_v53 = vld [vmem:[%s7754_s2 + $0x270] ss:$60 sps:$4 sm:$0xff]   ;;  %v5411_v55 = vld [vmem:[%s7754_s2 + $0x178] ss:$60 sps:$4 sm:$0xff]  }
  0x21   :  { %v5389_v54 = vld [vmem:[%s7754_s2 + $0x2ec] ss:$60 sps:$4 sm:$0xff]   ;;  %v5419_v56 = vld [vmem:[%s7754_s2 + $0x1f4] ss:$60 sps:$4 sm:$0xff]   ;;  %v5392_v58 = vld [vmem:[%s7754_s2 + $0x364] ss:$60 sps:$4 sm:$0xff]  }
  0x22   :  { %911 = vmatpush1.bf16.msra.mxu1 %v5335_v14  ;;  %v5387_v57 = vld [vmem:[%s7754_s2 + $0x2e8] ss:$60 sps:$4 sm:$0xff]   ;;  %v5417_v59 = vld [vmem:[%s7754_s2 + $0x1f0] ss:$60 sps:$4 sm:$0xff]   ;;  %v5390_v61 = vld [vmem:[%s7754_s2 + $0x360] ss:$60 sps:$4 sm:$0xff]  }
  0x23   :  { %912 = vmatprep.subr.bf16.mxu1 %v5336_v16  ;;  %870 = vmatpush1.bf16.msra.mxu0 %v5368_v25  ;;  %v5425_v60 = vld [vmem:[%s7754_s2 + $0x26c] ss:$60 sps:$4 sm:$0xff]   ;;  %v5431_v0 = vld [vmem:[%s7754_s2 + $0x2e4] ss:$60 sps:$4 sm:$0xff]   ;;  %v5437_v5 = vld [vmem:[%s7754_s2 + $0x35c] ss:$60 sps:$4 sm:$0xff]  }
  0x24   :  { %871 = vmatprep.subr.bf16.mxu0 %v5372_v27  ;;  %v5398_v62 = vld [vmem:[%s7754_s2 + $0x2c] ss:$60 sps:$4 sm:$0xff]   ;;  %v5404_v3 = vld [vmem:[%s7754_s2 + $0xa4] ss:$60 sps:$4 sm:$0xff]   ;;  %v5410_v7 = vld [vmem:[%s7754_s2 + $0x11c] ss:$60 sps:$4 sm:$0xff]  }
  0x25   :  { %v5423_v63 = vld [vmem:[%s7754_s2 + $0x268] ss:$60 sps:$4 sm:$0xff]   ;;  %v5429_v4 = vld [vmem:[%s7754_s2 + $0x2e0] ss:$60 sps:$4 sm:$0xff]   ;;  %v5435_v8 = vld [vmem:[%s7754_s2 + $0x358] ss:$60 sps:$4 sm:$0xff]  }
  0x26   :  { %913 = vmatpush1.bf16.msra.mxu1 %v5338_v19  ;;  %v5396_v1 = vld [vmem:[%s7754_s2 + $0x28] ss:$60 sps:$4 sm:$0xff]   ;;  %v5402_v6 = vld [vmem:[%s7754_s2 + $0xa0] ss:$60 sps:$4 sm:$0xff]   ;;  %v5408_v10 = vld [vmem:[%s7754_s2 + $0x118] ss:$60 sps:$4 sm:$0xff]  }
  0x27   :  { %914 = vmatprep.subr.bf16.mxu1 %v5339_v20  ;;  %872 = vmatpush1.bf16.msra.mxu0 %v5374_v30  ;;  %v5450_v9 = vld [vmem:[%s7754_s2 + $0x24] ss:$60 sps:$4 sm:$0xff]   ;;  %v5416_v11 = vld [vmem:[%s7754_s2 + $0x194] ss:$60 sps:$4 sm:$0xff]   ;;  %v5454_v13 = vld [vmem:[%s7754_s2 + $0x9c] ss:$60 sps:$4 sm:$0xff]  }
  0x28   :  { %873 = vmatprep.subr.bf16.mxu0 %v5378_v32  ;;  %v5448_v12 = vld [vmem:[%s7754_s2 + $0x20] ss:$60 sps:$4 sm:$0xff]   ;;  %v5414_v14 = vld [vmem:[%s7754_s2 + $0x190] ss:$60 sps:$4 sm:$0xff]   ;;  %v5452_v16 = vld [vmem:[%s7754_s2 + $0x98] ss:$60 sps:$4 sm:$0xff]  }
  0x29   :  { %v5422_v15 = vld [vmem:[%s7754_s2 + $0x20c] ss:$60 sps:$4 sm:$0xff]   ;;  %v5457_v17 = vld [vmem:[%s7754_s2 + $0x114] ss:$60 sps:$4 sm:$0xff]   ;;  %v5428_v19 = vld [vmem:[%s7754_s2 + $0x284] ss:$60 sps:$4 sm:$0xff]  }
  0x2a   :  { %915 = vmatpush1.bf16.msra.mxu1 %v5341_v23  ;;  %v5420_v18 = vld [vmem:[%s7754_s2 + $0x208] ss:$60 sps:$4 sm:$0xff]   ;;  %v5455_v20 = vld [vmem:[%s7754_s2 + $0x110] ss:$60 sps:$4 sm:$0xff]   ;;  %v5426_v22 = vld [vmem:[%s7754_s2 + $0x280] ss:$60 sps:$4 sm:$0xff]  }
  0x2b   :  { %916 = vmatprep.subr.bf16.mxu1 %v5345_v24  ;;  %874 = vmatpush1.bf16.msra.mxu0 %v5380_v35  ;;  %v5460_v21 = vld [vmem:[%s7754_s2 + $0x18c] ss:$60 sps:$4 sm:$0xff]   ;;  %v5434_v23 = vld [vmem:[%s7754_s2 + $0x2fc] ss:$60 sps:$4 sm:$0xff]   ;;  %v5463_v25 = vld [vmem:[%s7754_s2 + $0x204] ss:$60 sps:$4 sm:$0xff]  }
  0x2c   :  { %875 = vmatprep.subr.bf16.mxu0 %v5384_v36  ;;  %v5458_v24 = vld [vmem:[%s7754_s2 + $0x188] ss:$60 sps:$4 sm:$0xff]   ;;  %v5440_v27 = vld [vmem:[%s7754_s2 + $0x374] ss:$60 sps:$4 sm:$0xff]   ;;  %v5461_v28 = vld [vmem:[%s7754_s2 + $0x200] ss:$60 sps:$4 sm:$0xff]  }
  0x2d   :  { %v5438_v30 = vld [vmem:[%s7754_s2 + $0x370] ss:$60 sps:$4 sm:$0xff]   ;;  %v5464_v32 = vld [vmem:[%s7754_s2 + $0x278] ss:$60 sps:$4 sm:$0xff]   ;;  %v5999_v35 = vmov 0.0   ;;  %vm3602_vm1 = vcmask 523264  }
  0x2e   :  { %917 = vmatpush1.bf16.msra.mxu1 %v5347_v26  ;;  %v5432_v26 = vld [vmem:[%s7754_s2 + $0x2f8] ss:$60 sps:$4 sm:$0xff]   ;;  %v5467_v36 = vld [vmem:[%s7754_s2 + $0x2f0] ss:$60 sps:$4 sm:$0xff]   ;;  %vm4454_vm2 = vcmask 785408   ;;  %s5021_s13 = sld [smem:[#allocation2 + $0x2]] }
  0x2f   :  { %984 = vmatprep.subr.bf16.mxu1 %v5353_v29  ;;  %876 = vmatpush1.bf16.msra.mxu0 %v5386_v39  ;;  %v5466_v29 = vld [vmem:[%s7754_s2 + $0x27c] ss:$60 sps:$4 sm:$0xff]   ;;  %v5470_v39 = vld [vmem:[%s7754_s2 + $0x368] ss:$60 sps:$4 sm:$0xff]   ;;  %vm4543_vm3 = vcmask 261120  }
  0x30   :  { %943 = vmatprep.subr.bf16.mxu0 %v5395_v40  ;;  %v5475_v40 = vld [vmem:[%s7754_s2 + $0x34] ss:$60 sps:$4 sm:$0xff]  }
  0x31   :  { %935 = vmatmul.mubr.bf16.vlgmr.msra.gmra.mrb[0].mxu1 %v6141_v31 }
  0x32   :  { %985 = vmatpush1.bf16.msra.mxu1 %v5351_v33  ;;  %1016 = vmatprep.mubr.bf16.mxu1 %v5998_v2  ;;  %v5469_v33 = vld [vmem:[%s7754_s2 + $0x2f4] ss:$60 sps:$4 sm:$0xff]  }
  0x33   :  { %986 = vmatprep.subr.bf16.mxu1 %v5359_v34  ;;  %894 = vmatmul.mubr.bf16.vlgmr.msra.gmra.mrb[0].mxu0 %v6141_v31  ;;  %v5441_v34 = vld [vmem:[%s7754_s2 + $0x38] ss:$60 sps:$4 sm:$0xff]  }
  0x34   :  { %944 = vmatpush1.bf16.msra.mxu0 %v5393_v43  ;;  %975 = vmatprep.mubr.bf16.mxu0 %v5998_v2  ;;  %v5478_v43 = vld [vmem:[%s7754_s2 + $0xac] ss:$60 sps:$4 sm:$0xff]  }
  0x35   :  { %945 = vmatprep.subr.bf16.mxu0 %v5401_v44  ;;  %v5444_v44 = vld [vmem:[%s7754_s2 + $0x1a0] ss:$60 sps:$4 sm:$0xff]  }
  0x36   :  { %987 = vmatpush1.bf16.msra.mxu1 %v5357_v37  ;;  %v5472_v37 = vld [vmem:[%s7754_s2 + $0x36c] ss:$60 sps:$4 sm:$0xff]  }
  0x37   :  { %988 = vmatprep.subr.bf16.mxu1 %v5365_v38  ;;  %v5442_v38 = vld [vmem:[%s7754_s2 + $0xb0] ss:$60 sps:$4 sm:$0xff]  }
  0x38   :  { %946 = vmatpush1.bf16.msra.mxu0 %v5399_v47  ;;  %v5481_v47 = vld [vmem:[%s7754_s2 + $0x124] ss:$60 sps:$4 sm:$0xff]  }
  0x39   :  { %947 = vmatprep.subr.bf16.mxu0 %v5407_v48  ;;  %v5479_v48 = vld [vmem:[%s7754_s2 + $0x120] ss:$60 sps:$4 sm:$0xff]  }
  0x3a   :  { %989 = vmatpush1.bf16.msra.mxu1 %v5363_v41  ;;  %v5443_v41 = vld [vmem:[%s7754_s2 + $0x128] ss:$60 sps:$4 sm:$0xff]  }
  0x3b   :  { %990 = vmatprep.subr.bf16.mxu1 %v5371_v42  ;;  %v5473_v42 = vld [vmem:[%s7754_s2 + $0x30] ss:$60 sps:$4 sm:$0xff]  }
  0x3c   :  { %948 = vmatpush1.bf16.msra.mxu0 %v5405_v51  ;;  %v5482_v51 = vld [vmem:[%s7754_s2 + $0x198] ss:$60 sps:$4 sm:$0xff]  }
  0x3d   :  { %949 = vmatprep.subr.bf16.mxu0 %v5413_v52  ;;  %v5487_v52 = vld [vmem:[%s7754_s2 + $0x214] ss:$60 sps:$4 sm:$0xff]  }
  0x3e   :  { %991 = vmatpush1.bf16.msra.mxu1 %v5369_v45  ;;  %v5445_v45 = vld [vmem:[%s7754_s2 + $0x218] ss:$60 sps:$4 sm:$0xff]  }
  0x3f   :  { %992 = vmatprep.subr.bf16.mxu1 %v5377_v46  ;;  %v5476_v46 = vld [vmem:[%s7754_s2 + $0xa8] ss:$60 sps:$4 sm:$0xff]  }
  0x40   :  { %950 = vmatpush1.bf16.msra.mxu0 %v5411_v55  ;;  %v5490_v55 = vld [vmem:[%s7754_s2 + $0x28c] ss:$60 sps:$4 sm:$0xff]  }
  0x41   :  { %951 = vmatprep.subr.bf16.mxu0 %v5419_v56  ;;  %v5451_v56 = vld [vmem:[%s7754_s2 + $0x380] ss:$60 sps:$4 sm:$0xff]  }
  0x42   :  { %993 = vmatpush1.bf16.msra.mxu1 %v5375_v49  ;;  %v5484_v49 = vld [vmem:[%s7754_s2 + $0x19c] ss:$60 sps:$4 sm:$0xff]  }
  0x43   :  { %994 = vmatprep.subr.bf16.mxu1 %v5383_v50  ;;  %v5446_v50 = vld [vmem:[%s7754_s2 + $0x290] ss:$60 sps:$4 sm:$0xff]  }
  0x44   :  { %952 = vmatpush1.bf16.msra.mxu0 %v5417_v59  ;;  %v5493_v59 = vld [vmem:[%s7754_s2 + $0x304] ss:$60 sps:$4 sm:$0xff]  }
  0x45   :  { %953 = vmatprep.subr.bf16.mxu0 %v5425_v60  ;;  %v5491_v60 = vld [vmem:[%s7754_s2 + $0x300] ss:$60 sps:$4 sm:$0xff]  }
  0x46   :  { %995 = vmatpush1.bf16.msra.mxu1 %v5381_v53  ;;  %v5447_v53 = vld [vmem:[%s7754_s2 + $0x308] ss:$60 sps:$4 sm:$0xff]  }
  0x47   :  { %996 = vmatprep.subr.bf16.mxu1 %v5389_v54  ;;  %v5485_v54 = vld [vmem:[%s7754_s2 + $0x210] ss:$60 sps:$4 sm:$0xff]  }
  0x48   :  { %954 = vmatpush1.bf16.msra.mxu0 %v5423_v63  ;;  %v5526_v63 = vld [vmem:[%s7756_s4 + $0x1c] ss:$12 sps:$4 sm:$0xff]  }
  0x49   :  { %955 = vmatprep.subr.bf16.mxu0 %v5431_v0  ;;  %v5494_v0 = vld [vmem:[%s7754_s2 + $0x378] ss:$60 sps:$4 sm:$0xff]  }
  0x4a   :  { %997 = vmatpush1.bf16.msra.mxu1 %v5387_v57  ;;  %v5488_v57 = vld [vmem:[%s7754_s2 + $0x288] ss:$60 sps:$4 sm:$0xff]  }
  0x4b   :  { %998 = vmatprep.subr.bf16.mxu1 %v5392_v58  ;;  %v5520_v58 = vld [vmem:[%s7756_s4 + $0x4] ss:$12 sps:$4 sm:$0xff]  }
  0x4c   :  { %956 = vmatpush1.bf16.msra.mxu0 %v5429_v4  ;;  %v5532_v4 = vld [vmem:[%s7756_s4 + $0x34] ss:$12 sps:$4 sm:$0xff]  }
  0x4d   :  { %957 = vmatprep.subr.bf16.mxu0 %v5437_v5  ;;  %v5497_v5 = vld [vmem:[%s7756_s4 + $0x180] ss:$12 sps:$4 sm:$0xff]  }
  0x4e   :  { %999 = vmatpush1.bf16.msra.mxu1 %v5390_v61  ;;  %v5518_v61 = vld [vmem:[%s7756_s4] ss:$12 sps:$4 sm:$0xff]  }
  0x4f   :  { %1066 = vmatprep.subr.bf16.mxu1 %v5398_v62  ;;  %v5496_v62 = vld [vmem:[%s7754_s2 + $0x37c] ss:$60 sps:$4 sm:$0xff]  }
  0x50   :  { %958 = vmatpush1.bf16.msra.mxu0 %v5435_v8  ;;  %v5538_v8 = vld [vmem:[%s7756_s4 + $0x4c] ss:$12 sps:$4 sm:$0xff]  }
  0x51   :  { %1017 = vmatmul.mubr.bf16.vlgmr.msra.gmra.mrb[4].mxu1 %v6141_v31  ;;  %1025 = vmatprep.subr.bf16.mxu0 %v5450_v9  ;;  %v5500_v9 = vld [vmem:[%s7756_s4 + $0x198] ss:$12 sps:$4 sm:$0xff]  }
  0x52   :  { %1067 = vmatpush1.bf16.msra.mxu1 %v5396_v1  ;;  %1098 = vmatprep.mubr.bf16.mxu1 %v5998_v2  ;;  %v5524_v1 = vld [vmem:[%s7756_s4 + $0x18] ss:$12 sps:$4 sm:$0xff]  }
  0x53   :  { %1068 = vmatprep.subr.bf16.mxu1 %v5404_v3  ;;  %976 = vmatmul.mubr.bf16.vlgmr.msra.gmra.mrb[4].mxu0 %v6141_v31  ;;  %v5499_v3 = vld [vmem:[%s7756_s4 + $0x184] ss:$12 sps:$4 sm:$0xff]  }
  0x54   :  { %1026 = vmatpush1.bf16.msra.mxu0 %v5448_v12  ;;  %1057 = vmatprep.mubr.bf16.mxu0 %v5998_v2  ;;  %v5544_v12 = vld [vmem:[%s7756_s4 + $0x64] ss:$12 sps:$4 sm:$0xff]  }
  0x55   :  { %1027 = vmatprep.subr.bf16.mxu0 %v5454_v13  ;;  %v5503_v13 = vld [vmem:[%s7756_s4 + $0x1b0] ss:$12 sps:$4 sm:$0xff]  }
  0x56   :  { %1069 = vmatpush1.bf16.msra.mxu1 %v5402_v6  ;;  %v5530_v6 = vld [vmem:[%s7756_s4 + $0x30] ss:$12 sps:$4 sm:$0xff]  }
  0x57   :  { %1070 = vmatprep.subr.bf16.mxu1 %v5410_v7  ;;  %v5502_v7 = vld [vmem:[%s7756_s4 + $0x19c] ss:$12 sps:$4 sm:$0xff]  }
  0x58   :  { %1028 = vmatpush1.bf16.msra.mxu0 %v5452_v16  ;;  %v5506_v16 = vld [vmem:[%s7756_s4 + $0x1c8] ss:$12 sps:$4 sm:$0xff]  }
  0x59   :  { %1029 = vmatprep.subr.bf16.mxu0 %v5457_v17  ;;  %v5548_v17 = vld [vmem:[%s7756_s4 + $0x78] ss:$12 sps:$4 sm:$0xff]  }
  0x5a   :  { %1071 = vmatpush1.bf16.msra.mxu1 %v5408_v10  ;;  %v5536_v10 = vld [vmem:[%s7756_s4 + $0x48] ss:$12 sps:$4 sm:$0xff]  }
  0x5b   :  { %1072 = vmatprep.subr.bf16.mxu1 %v5416_v11  ;;  %v5505_v11 = vld [vmem:[%s7756_s4 + $0x1b4] ss:$12 sps:$4 sm:$0xff]  }
  0x5c   :  { %1030 = vmatpush1.bf16.msra.mxu0 %v5455_v20  ;;  %v5509_v20 = vld [vmem:[%s7756_s4 + $0x1e0] ss:$12 sps:$4 sm:$0xff]  }
  0x5d   :  { %1031 = vmatprep.subr.bf16.mxu0 %v5460_v21  ;;  %v5554_v21 = vld [vmem:[%s7756_s4 + $0x90] ss:$12 sps:$4 sm:$0xff]  }
  0x5e   :  { %1073 = vmatpush1.bf16.msra.mxu1 %v5414_v14  ;;  %v5508_v14 = vld [vmem:[%s7756_s4 + $0x1cc] ss:$12 sps:$4 sm:$0xff]  }
  0x5f   :  { %1074 = vmatprep.subr.bf16.mxu1 %v5422_v15  ;;  %v5550_v15 = vld [vmem:[%s7756_s4 + $0x7c] ss:$12 sps:$4 sm:$0xff]  }
  0x60   :  { %1032 = vmatpush1.bf16.msra.mxu0 %v5458_v24  ;;  %v5512_v24 = vld [vmem:[%s7756_s4 + $0x1f8] ss:$12 sps:$4 sm:$0xff]  }
  0x61   :  { %1033 = vmatprep.subr.bf16.mxu0 %v5463_v25  ;;  %v5560_v25 = vld [vmem:[%s7756_s4 + $0xa8] ss:$12 sps:$4 sm:$0xff]  }
  0x62   :  { %1075 = vmatpush1.bf16.msra.mxu1 %v5420_v18  ;;  %v5511_v18 = vld [vmem:[%s7756_s4 + $0x1e4] ss:$12 sps:$4 sm:$0xff]  }
  0x63   :  { %1076 = vmatprep.subr.bf16.mxu1 %v5428_v19  ;;  %v5556_v19 = vld [vmem:[%s7756_s4 + $0x94] ss:$12 sps:$4 sm:$0xff]  }
  0x64   :  { %1034 = vmatpush1.bf16.msra.mxu0 %v5461_v28  ;;  %v5515_v28 = vld [vmem:[%s7756_s4 + $0x210] ss:$12 sps:$4 sm:$0xff]  }
  0x65   :  { %1035 = vmatprep.subr.bf16.mxu0 %v5466_v29  ;;  %v5566_v29 = vld [vmem:[%s7756_s4 + $0xc0] ss:$12 sps:$4 sm:$0xff]  }
  0x66   :  { %1077 = vmatpush1.bf16.msra.mxu1 %v5426_v22  ;;  %v5514_v22 = vld [vmem:[%s7756_s4 + $0x1fc] ss:$12 sps:$4 sm:$0xff]  }
  0x67   :  { %1078 = vmatprep.subr.bf16.mxu1 %v5434_v23  ;;  %v5562_v23 = vld [vmem:[%s7756_s4 + $0xac] ss:$12 sps:$4 sm:$0xff]  }
  0x68   :  { %1036 = vmatpush1.bf16.msra.mxu0 %v5464_v32  ;;  %v5523_v32 = vld [vmem:[%s7756_s4 + $0x22c] ss:$12 sps:$4 sm:$0xff]  }
  0x69   :  { %1037 = vmatprep.subr.bf16.mxu0 %v5469_v33  ;;  %v5521_v33 = vld [vmem:[%s7756_s4 + $0x228] ss:$12 sps:$4 sm:$0xff]  }
  0x6a   :  { %1079 = vmatpush1.bf16.msra.mxu1 %v5432_v26  ;;  %v5568_v26 = vld [vmem:[%s7756_s4 + $0xc4] ss:$12 sps:$4 sm:$0xff]  }
  0x6b   :  { %1080 = vmatprep.subr.bf16.mxu1 %v5440_v27  ;;  %v5517_v27 = vld [vmem:[%s7756_s4 + $0x214] ss:$12 sps:$4 sm:$0xff]  }
  0x6c   :  { %1038 = vmatpush1.bf16.msra.mxu0 %v5467_v36  ;;  %v5580_v36 = vld [vmem:[%s7756_s4 + $0xf4] ss:$12 sps:$4 sm:$0xff]  }
  0x6d   :  { %1039 = vmatprep.subr.bf16.mxu0 %v5472_v37  ;;  %v5529_v37 = vld [vmem:[%s7756_s4 + $0x244] ss:$12 sps:$4 sm:$0xff]  }
  0x6e   :  { %1081 = vmatpush1.bf16.msra.mxu1 %v5438_v30  ;;  %v5574_v30 = vld [vmem:[%s7756_s4 + $0xdc] ss:$12 sps:$4 sm:$0xff]  }
  0x6f   :  { %5243 = vmatprep.subr.bf16.mxu1 %v5999_v35 }
  0x70   :  { %1040 = vmatpush1.bf16.msra.mxu0 %v5470_v39  ;;  %v5578_v39 = vld [vmem:[%s7756_s4 + $0xf0] ss:$12 sps:$4 sm:$0xff]  }
  0x71   :  { %1099 = vmatmul.mubr.bf16.vlgmr.msra.gmra.mrb[8].mxu1 %v6141_v31  ;;  %1107 = vmatprep.subr.bf16.mxu0 %v5475_v40  ;;  %v5586_v40 = vld [vmem:[%s7756_s4 + $0x10c] ss:$12 sps:$4 sm:$0xff]  }
  0x72   :  { %5244 = vmatpush3.bf16.msra.mxu1 %v5441_v34  ;;  %5259 = vmatprep.mubr.msk.bf16.mxu1 %vm6000_vm0, %v5999_v35  ;;  %v5572_v34 = vld [vmem:[%s7756_s4 + $0xd8] ss:$12 sps:$4 sm:$0xff]  }
  0x73   :  { %5245 = vmatprep.subr.bf16.mxu1 %v5999_v35  ;;  %1058 = vmatmul.mubr.bf16.vlgmr.msra.gmra.mrb[8].mxu0 %v6141_v31 }
  0x74   :  { %1108 = vmatpush1.bf16.msra.mxu0 %v5473_v42  ;;  %1139 = vmatprep.mubr.bf16.mxu0 %v5998_v2  ;;  %v5533_v42 = vld [vmem:[%s7756_s4 + $0x258] ss:$12 sps:$4 sm:$0xff]  }
  0x75   :  { %1109 = vmatprep.subr.bf16.mxu0 %v5478_v43  ;;  %v5584_v43 = vld [vmem:[%s7756_s4 + $0x108] ss:$12 sps:$4 sm:$0xff]  }
  0x76   :  { %5246 = vmatpush3.bf16.msra.mxu1 %v5442_v38  ;;  %v5527_v38 = vld [vmem:[%s7756_s4 + $0x240] ss:$12 sps:$4 sm:$0xff]  }
  0x77   :  { %5247 = vmatprep.subr.bf16.mxu1 %v5999_v35 }
  0x78   :  { %1110 = vmatpush1.bf16.msra.mxu0 %v5476_v46  ;;  %v5539_v46 = vld [vmem:[%s7756_s4 + $0x270] ss:$12 sps:$4 sm:$0xff]  }
  0x79   :  { %1111 = vmatprep.subr.bf16.mxu0 %v5481_v47  ;;  %v5590_v47 = vld [vmem:[%s7756_s4 + $0x120] ss:$12 sps:$4 sm:$0xff]  }
  0x7a   :  { %5248 = vmatpush3.bf16.msra.mxu1 %v5443_v41  ;;  %v5535_v41 = vld [vmem:[%s7756_s4 + $0x25c] ss:$12 sps:$4 sm:$0xff]  }
  0x7b   :  { %5249 = vmatprep.subr.bf16.mxu1 %v5999_v35 }
  0x7c   :  { %1112 = vmatpush1.bf16.msra.mxu0 %v5479_v48  ;;  %v5598_v48 = vld [vmem:[%s7756_s4 + $0x13c] ss:$12 sps:$4 sm:$0xff]  }
  0x7d   :  { %1113 = vmatprep.subr.bf16.mxu0 %v5484_v49  ;;  %v5547_v49 = vld [vmem:[%s7756_s4 + $0x28c] ss:$12 sps:$4 sm:$0xff]  }
  0x7e   :  { %5250 = vmatpush3.bf16.msra.mxu1 %v5444_v44  ;;  %v5592_v44 = vld [vmem:[%s7756_s4 + $0x124] ss:$12 sps:$4 sm:$0xff]  }
  0x7f   :  { %5251 = vmatprep.subr.bf16.mxu1 %v5999_v35 }
  0x80   :  { %1114 = vmatpush1.bf16.msra.mxu0 %v5482_v51  ;;  %v5596_v51 = vld [vmem:[%s7756_s4 + $0x138] ss:$12 sps:$4 sm:$0xff]  }
  0x81   :  { %1115 = vmatprep.subr.bf16.mxu0 %v5487_v52  ;;  %v5604_v52 = vld [vmem:[%s7756_s4 + $0x154] ss:$12 sps:$4 sm:$0xff]  }
  0x82   :  { %5252 = vmatpush3.bf16.msra.mxu1 %v5445_v45  ;;  %v5541_v45 = vld [vmem:[%s7756_s4 + $0x274] ss:$12 sps:$4 sm:$0xff]  }
  0x83   :  { %5253 = vmatprep.subr.bf16.mxu1 %v5999_v35 }
  0x84   :  { %1116 = vmatpush1.bf16.msra.mxu0 %v5485_v54  ;;  %v5551_v54 = vld [vmem:[%s7756_s4 + $0x2a0] ss:$12 sps:$4 sm:$0xff]  }
  0x85   :  { %1117 = vmatprep.subr.bf16.mxu0 %v5490_v55  ;;  %v5602_v55 = vld [vmem:[%s7756_s4 + $0x150] ss:$12 sps:$4 sm:$0xff]  }
  0x86   :  { %5254 = vmatpush3.bf16.msra.mxu1 %v5446_v50  ;;  %v5545_v50 = vld [vmem:[%s7756_s4 + $0x288] ss:$12 sps:$4 sm:$0xff]  }
  0x87   :  { %5255 = vmatprep.subr.bf16.mxu1 %v5999_v35 }
  0x88   :  { %1118 = vmatpush1.bf16.msra.mxu0 %v5488_v57  ;;  %v5559_v57 = vld [vmem:[%s7756_s4 + $0x2bc] ss:$12 sps:$4 sm:$0xff]  }
  0x89   :  { %1119 = vmatprep.subr.bf16.mxu0 %v5493_v59  ;;  %v5608_v59 = vld [vmem:[%s7756_s4 + $0x168] ss:$12 sps:$4 sm:$0xff]  }
  0x8a   :  { %5256 = vmatpush3.bf16.msra.mxu1 %v5447_v53  ;;  %v5553_v53 = vld [vmem:[%s7756_s4 + $0x2a4] ss:$12 sps:$4 sm:$0xff]  }
  0x8b   :  { %5257 = vmatprep.subr.bf16.mxu1 %v5999_v35 }
  0x8c   :  { %1120 = vmatpush1.bf16.msra.mxu0 %v5491_v60  ;;  %v5565_v60 = vld [vmem:[%s7756_s4 + $0x2d4] ss:$12 sps:$4 sm:$0xff]  }
  0x8d   :  { %1121 = vmatprep.subr.bf16.mxu0 %v5496_v62  ;;  %v5571_v62 = vld [vmem:[%s7756_s4 + $0x2ec] ss:$12 sps:$4 sm:$0xff]  }
  0x8e   :  { %5258 = vmatpush3.bf16.msra.mxu1 %v5451_v56  ;;  %v5610_v56 = vld [vmem:[%s7756_s4 + $0x16c] ss:$12 sps:$4 sm:$0xff]  }
  0x8f   :  { %3606 = vmatprep.subr.bf16.mxu1 %v5520_v58  ;;  %v5557_v58 = vld [vmem:[%s7756_s4 + $0x2b8] ss:$12 sps:$4 sm:$0xff]  }
  0x90   :  { %1122 = vmatpush1.bf16.msra.mxu0 %v5494_v0  ;;  %v5577_v0 = vld [vmem:[%s7756_s4 + $0x304] ss:$12 sps:$4 sm:$0xff]  }
  0x91   :  { %5260 = vmatmul.mubr.bf16.vlgmr.msra.gmra.mrb[12].mxu1 %v6141_v31  ;;  %3647 = vmatprep.subr.bf16.mxu0 %v5499_v3  ;;  %v178_v3 = vlaneseq }
  0x92   :  { %3607 = vmatpush1.bf16.msra.mxu1 %v5518_v61  ;;  %v5563_v61 = vld [vmem:[%s7756_s4 + $0x2d0] ss:$12 sps:$4 sm:$0xff]  }
  0x93   :  { %3608 = vmatprep.subr.bf16.mxu1 %v5526_v63  ;;  %1140 = vmatmul.mubr.bf16.vlgmr.msra.gmra.mrb[12].mxu0 %v6141_v31  ;;  %v5542_v31 = vld [vmem:[%s7756_s4 + $0x60] ss:$12 sps:$4 sm:$0xff]   ;;  %v5569_v63 = vld [vmem:[%s7756_s4 + $0x2e8] ss:$12 sps:$4 sm:$0xff]  }
  0x94   :  { %3648 = vmatpush1.bf16.msra.mxu0 %v5497_v5 }
  0x95   :  { %3649 = vmatprep.subr.bf16.mxu0 %v5502_v7 }
  0x96   :  { %3609 = vmatpush1.bf16.msra.mxu1 %v5524_v1  ;;  %v5655_v1 = vld [vmem:[%s7756_s4 + $0xa84] ss:$12 sps:$4 sm:$0xff]  }
  0x97   :  { %3610 = vmatprep.subr.bf16.mxu1 %v5532_v4  ;;  %v6637_v4 = vshrl.u32 %v178_v3, 7  ;;  %v5671_v3 = vld [vmem:[%s7756_s4 + $0xac8] ss:$12 sps:$4 sm:$0xff]  }
  0x98   :  { %3650 = vmatpush1.bf16.msra.mxu0 %v5500_v9 }
  0x99   :  { %3651 = vmatprep.subr.bf16.mxu0 %v5505_v11  ;;  %v6640_v5 = vsub.s32 2, %v6637_v4  ;;  %v192_v7 = vsub.s32 3, %v6637_v4 }
  0x9a   :  { %3611 = vmatpush1.bf16.msra.mxu1 %v5530_v6  ;;  %v6645_v6 = vld [vmem:[%s7755_s3] sm:$0xff] }
  0x9b   :  { %3612 = vmatprep.subr.bf16.mxu1 %v5538_v8  ;;  %v189_v8 = vrot.slane %v6645_v6, %v6640_v5  ;;  %v193_v9 = vrot.slane %v6645_v6, %v192_v7 }
  0x9c   :  { %3652 = vmatpush1.bf16.msra.mxu0 %v5503_v13  ;;  %v6653_v13 = vstv %s44_s20 }
  0x9d   :  { %3653 = vmatprep.subr.bf16.mxu0 %v5508_v14 }
  0x9e   :  { %3613 = vmatpush1.bf16.msra.mxu1 %v5536_v10 }
  0x9f   :  { %3614 = vmatprep.subr.bf16.mxu1 %v5544_v12 }
  0xa0   :  { %3654 = vmatpush1.bf16.msra.mxu0 %v5506_v16 }
  0xa1   :  { %3655 = vmatprep.subr.bf16.mxu0 %v5511_v18 }
  0xa2   :  { %3615 = vmatpush1.bf16.msra.mxu1 %v5542_v31 }
  0xa3   :  { %3616 = vmatprep.subr.bf16.mxu1 %v5550_v15 }
  0xa4   :  { %3656 = vmatpush1.bf16.msra.mxu0 %v5509_v20 }
  0xa5   :  { %3657 = vmatprep.subr.bf16.mxu0 %v5514_v22 }
  0xa6   :  { %3617 = vmatpush1.bf16.msra.mxu1 %v5548_v17  ;;  %v6656_v17 = vsub.s32 0, %v6637_v4 }
  0xa7   :  { %3618 = vmatprep.subr.bf16.mxu1 %v5556_v19  ;;  %v6659_v19 = vsub.s32 1, %v6637_v4 }
  0xa8   :  { %3658 = vmatpush1.bf16.msra.mxu0 %v5512_v24 }
  0xa9   :  { %3659 = vmatprep.subr.bf16.mxu0 %v5517_v27  ;;  %v185_v27 = vrot.slane %v6645_v6, %v6659_v19 }
  0xaa   :  { %3619 = vmatpush1.bf16.msra.mxu1 %v5554_v21 }
  0xab   :  { %3620 = vmatprep.subr.bf16.mxu1 %v5562_v23 }
  0xac   :  { %3660 = vmatpush1.bf16.msra.mxu0 %v5515_v28 }
  0xad   :  { %3661 = vmatprep.subr.bf16.mxu0 %v5523_v32 }
  0xae   :  { %3621 = vmatpush1.bf16.msra.mxu1 %v5560_v25  ;;  %v181_v25 = vrot.slane %v6645_v6, %v6656_v17 }
  0xaf   :  { %3622 = vmatprep.subr.bf16.mxu1 %v5568_v26 }
  0xb0   :  { %3662 = vmatpush1.bf16.msra.mxu0 %v5521_v33  ;;  %v5583_v33 = vld [vmem:[%s7756_s4 + $0x31c] ss:$12 sps:$4 sm:$0xff]  }
  0xb1   :  { %3663 = vmatprep.subr.bf16.mxu0 %v5529_v37 }
  0xb2   :  { %3623 = vmatpush1.bf16.msra.mxu1 %v5566_v29  ;;  %v5575_v29 = vld [vmem:[%s7756_s4 + $0x300] ss:$12 sps:$4 sm:$0xff]  }
  0xb3   :  { %3624 = vmatprep.subr.bf16.mxu1 %v5574_v30 }
  0xb4   :  { %3664 = vmatpush1.bf16.msra.mxu0 %v5527_v38 }
  0xb5   :  { %3665 = vmatprep.subr.bf16.mxu0 %v5535_v41 }
  0xb6   :  { %3625 = vmatpush1.bf16.msra.mxu1 %v5572_v34 }
  0xb7   :  { %3626 = vmatprep.subr.bf16.mxu1 %v5580_v36 }
  0xb8   :  { %3666 = vmatpush1.bf16.msra.mxu0 %v5533_v42  ;;  %v5581_v42 = vld [vmem:[%s7756_s4 + $0x318] ss:$12 sps:$4 sm:$0xff]  }
  0xb9   :  { %3667 = vmatprep.subr.bf16.mxu0 %v5541_v45  ;;  %v5589_v45 = vld [vmem:[%s7756_s4 + $0x334] ss:$12 sps:$4 sm:$0xff]  }
  0xba   :  { %3627 = vmatpush1.bf16.msra.mxu1 %v5578_v39 }
  0xbb   :  { %3628 = vmatprep.subr.bf16.mxu1 %v5586_v40 }
  0xbc   :  { %3668 = vmatpush1.bf16.msra.mxu0 %v5539_v46 }
  0xbd   :  { %3669 = vmatprep.subr.bf16.mxu0 %v5547_v49  ;;  %v5587_v49 = vld [vmem:[%s7756_s4 + $0x330] ss:$12 sps:$4 sm:$0xff]  }
  0xbe   :  { %3629 = vmatpush1.bf16.msra.mxu1 %v5584_v43 }
  0xbf   :  { %3630 = vmatprep.subr.bf16.mxu1 %v5592_v44 }
  0xc0   :  { %3670 = vmatpush1.bf16.msra.mxu0 %v5545_v50 }
  0xc1   :  { %3671 = vmatprep.subr.bf16.mxu0 %v5553_v53 }
  0xc2   :  { %3631 = vmatpush1.bf16.msra.mxu1 %v5590_v47 }
  0xc3   :  { %3632 = vmatprep.subr.bf16.mxu1 %v5598_v48 }
  0xc4   :  { %3672 = vmatpush1.bf16.msra.mxu0 %v5551_v54  ;;  %v5653_v54 = vld [vmem:[%s7756_s4 + $0xa80] ss:$12 sps:$4 sm:$0xff]  }
  0xc5   :  { %3673 = vmatprep.subr.bf16.mxu0 %v5559_v57  ;;  %v5601_v57 = vld [vmem:[%s7756_s4 + $0x364] ss:$12 sps:$4 sm:$0xff]  }
  0xc6   :  { %3633 = vmatpush1.bf16.msra.mxu1 %v5596_v51  ;;  %v5595_v51 = vld [vmem:[%s7756_s4 + $0x34c] ss:$12 sps:$4 sm:$0xff]  }
  0xc7   :  { %3634 = vmatprep.subr.bf16.mxu1 %v5604_v52 }
  0xc8   :  { %3674 = vmatpush1.bf16.msra.mxu0 %v5557_v58  ;;  %v5659_v58 = vld [vmem:[%s7756_s4 + $0xa98] ss:$12 sps:$4 sm:$0xff]  }
  0xc9   :  { %3675 = vmatprep.subr.bf16.mxu0 %v5565_v60  ;;  %v5599_v60 = vld [vmem:[%s7756_s4 + $0x360] ss:$12 sps:$4 sm:$0xff]  }
  0xca   :  { %3635 = vmatpush1.bf16.msra.mxu1 %v5602_v55  ;;  %v5661_v55 = vld [vmem:[%s7756_s4 + $0xa9c] ss:$12 sps:$4 sm:$0xff]  }
  0xcb   :  { %3636 = vmatprep.subr.bf16.mxu1 %v5610_v56  ;;  %v5593_v56 = vld [vmem:[%s7756_s4 + $0x348] ss:$12 sps:$4 sm:$0xff]  }
  0xcc   :  { %3676 = vmatpush1.bf16.msra.mxu0 %v5563_v61  ;;  %v5607_v61 = vld [vmem:[%s7756_s4 + $0x37c] ss:$12 sps:$4 sm:$0xff]  }
  0xcd   :  { %3677 = vmatprep.subr.bf16.mxu0 %v5571_v62  ;;  %v5673_v62 = vld [vmem:[%s7756_s4 + $0xacc] ss:$12 sps:$4 sm:$0xff]  }
  0xce   :  { %3637 = vmatpush1.bf16.msra.mxu1 %v5608_v59  ;;  %v5667_v59 = vld [vmem:[%s7756_s4 + $0xab4] ss:$12 sps:$4 sm:$0xff]  }
  0xcf   :  { %3893 = vmatprep.subr.bf16.mxu1 %v5655_v1 }
  0xd0   :  { %3678 = vmatpush1.bf16.msra.mxu0 %v5569_v63  ;;  %v5605_v63 = vld [vmem:[%s7756_s4 + $0x378] ss:$12 sps:$4 sm:$0xff]  }
  0xd1   :  { %3688 = vmatprep.subr.bf16.mxu0 %v5577_v0  ;;  %v5613_v0 = vld [vmem:[%s7756_s4 + $0x394] ss:$12 sps:$4 sm:$0xff]  }
 0x104   :  { %v936_v10 = vpop.f32.mrb[0].mxu1 }
 0x105   :  { %v937_v11 = vadd.f32 %v936_v10, %v189_v8  ;;  %v938_v12 = vpop.f32.mrb[1].mxu1  ;;  %v5611_v10 = vld [vmem:[%s7756_s4 + $0x390] ss:$12 sps:$4 sm:$0xff]  }
 0x106   :  { %v939_v31 = vadd.f32 %v938_v12, %v193_v9  ;;  %v940_v14 = vpop.f32.mrb[2].mxu1  ;;  %v895_v30 = vpop.f32.mrb[0].mxu0  ;;  %v5677_v9 = vld [vmem:[%s7756_s4 + $0xc8] ss:$12 sps:$4 sm:$0xff]   ;;  %v5616_v12 = vld [vmem:[%s7756_s4 + $0x3ac] ss:$12 sps:$4 sm:$0xff]  }
 0x107   :  { %v1205_v15 = vmin.f32 %v937_v11, 0.0  ;;  %v941_v16 = vpop.f32.mrb[3].mxu1  ;;  %v1190_v20 = vmax.f32 %v937_v11, 0.0  ;;  %v896_v34 = vadd.f32 %v895_v30, %v181_v25  ;;  %v897_v36 = vpop.f32.mrb[1].mxu0  ;;  %v200_v14 = vsub.s32 5, %v6637_v4 }
 0x108   :  { %v1206_v18 = vmin.f32 %v939_v31, 0.0  ;;  %v1191_v22 = vmax.f32 %v939_v31, 0.0  ;;  %v898_v37 = vadd.f32 %v897_v36, %v185_v27  ;;  %v899_v38 = vpop.f32.mrb[2].mxu0  ;;  %v5619_v16 = vld [vmem:[%s7756_s4 + $0x3c4] ss:$12 sps:$4 sm:$0xff]  }
 0x109   :  { %v1221_v21 = vmul.f32 %v6653_v13, %v1205_v15  ;;  %v1188_v39 = vmax.f32 %v896_v34, 0.0  ;;  %v1203_v40 = vmin.f32 %v896_v34, 0.0  ;;  %v900_v41 = vpop.f32.mrb[3].mxu0  ;;  %v5614_v15 = vld [vmem:[%s7756_s4 + $0x3a8] ss:$12 sps:$4 sm:$0xff]  }
 0x10a   :  { %v1222_v23 = vmul.f32 %v6653_v13, %v1206_v18  ;;  %v1189_v43 = vmax.f32 %v898_v37, 0.0  ;;  %v1204_v44 = vmin.f32 %v898_v37, 0.0  ;;  %v201_v18 = vrot.slane %v6645_v6, %v200_v14  ;;  %v5620_v27 = vld [vmem:[%s7756_s4 + $0x3d8] ss:$12 sps:$4 sm:$0xff]   ;;  %v5623_v36 = vld [vmem:[%s7756_s4 + $0x3f0] ss:$12 sps:$4 sm:$0xff]  }
 0x10b   :  { %v1236_v24 = vadd.f32 %v1221_v21, %v1190_v20  ;;  %v1219_v46 = vmul.f32 %v6653_v13, %v1203_v40  ;;  %v5617_v20 = vld [vmem:[%s7756_s4 + $0x3c0] ss:$12 sps:$4 sm:$0xff]   ;;  %v208_v40 = vsub.s32 7, %v6637_v4 }
 0x10c   :  { %v1237_v26 = vadd.f32 %v1222_v23, %v1191_v22  ;;  %v1220_v47 = vmul.f32 %v6653_v13, %v1204_v44  ;;  %v5622_v22 = vld [vmem:[%s7756_s4 + $0x3dc] ss:$12 sps:$4 sm:$0xff]   ;;  %v5628_v37 = vld [vmem:[%s7756_s4 + $0x40c] ss:$12 sps:$4 sm:$0xff]  }
 0x10d   :  { %v6672_v32 = vpack.c.bf16 %v1236_v24, %v1236_v24  ;;  %v1234_v48 = vadd.f32 %v1219_v46, %v1188_v39  ;;  %v196_v39 = vsub.s32 4, %v6637_v4  ;;  %v5629_v46 = vld [vmem:[%s7756_s4 + $0x420] ss:$12 sps:$4 sm:$0xff]  }
 0x10e   :  { %v6667_v28 = vpack.c.bf16 %v1237_v26, %v1237_v26  ;;  %v1235_v50 = vadd.f32 %v1220_v47, %v1189_v43  ;;  %v5631_v43 = vld [vmem:[%s7756_s4 + $0x424] ss:$12 sps:$4 sm:$0xff]  }
 0x10f   :  { %v6693_v52 = vpack.c.bf16 %v1234_v48, %v1234_v48  ;;  %v197_v44 = vrot.slane %v6645_v6, %v196_v39  ;;  %v5634_v48 = vld [vmem:[%s7756_s4 + $0x43c] ss:$12 sps:$4 sm:$0xff]  }
 0x110   :  { %3679 = vmatprep.mubr.bf16.mxu0 %v6667_v28  ;;  %v6695_v53 = vpack.c.bf16 %v1235_v50, %v1235_v50  ;;  %v5632_v50 = vld [vmem:[%s7756_s4 + $0x438] ss:$12 sps:$4 sm:$0xff]  }
 0x111   :  { %3680 = vmatmul.mubr.bf16.vlgmr.msra.gmra.mrb[16].mxu0 %v6672_v32 }
 0x112   :  { %3689 = vmatpush1.bf16.msra.mxu0 %v5575_v29  ;;  %3638 = vmatprep.mubr.bf16.mxu1 %v6695_v53 }
 0x113   :  { %3690 = vmatprep.subr.bf16.mxu0 %v5583_v33  ;;  %3639 = vmatmul.mubr.bf16.vlgmr.msra.gmra.mrb[16].mxu1 %v6693_v52  ;;  %v5625_v33 = vld [vmem:[%s7756_s4 + $0x3f4] ss:$12 sps:$4 sm:$0xff]  }
 0x114   :  { %3894 = vmatpush1.bf16.msra.mxu1 %v5653_v54  ;;  %3925 = vmatprep.mubr.bf16.mxu1 %v5998_v2  ;;  %v5665_v2 = vld [vmem:[%s7756_s4 + $0xab0] ss:$12 sps:$4 sm:$0xff]  }
 0x115   :  { %3895 = vmatprep.subr.bf16.mxu1 %v5661_v55 }
 0x116   :  { %3691 = vmatpush1.bf16.msra.mxu0 %v5581_v42  ;;  %v5626_v42 = vld [vmem:[%s7756_s4 + $0x408] ss:$12 sps:$4 sm:$0xff]  }
 0x117   :  { %3692 = vmatprep.subr.bf16.mxu0 %v5589_v45  ;;  %v209_v45 = vrot.slane %v6645_v6, %v208_v40 }
 0x118   :  { %3896 = vmatpush1.bf16.msra.mxu1 %v5659_v58  ;;  %v5635_v58 = vld [vmem:[%s7756_s4 + $0x450] ss:$12 sps:$4 sm:$0xff]  }
 0x119   :  { %3897 = vmatprep.subr.bf16.mxu1 %v5667_v59 }
 0x11a   :  { %3693 = vmatpush1.bf16.msra.mxu0 %v5587_v49 }
 0x11b   :  { %3694 = vmatprep.subr.bf16.mxu0 %v5595_v51  ;;  %v5637_v51 = vld [vmem:[%s7756_s4 + $0x454] ss:$12 sps:$4 sm:$0xff]  }
 0x11c   :  { %3898 = vmatpush1.bf16.msra.mxu1 %v5665_v2  ;;  %v5640_v2 = vld [vmem:[%s7756_s4 + $0x46c] ss:$12 sps:$4 sm:$0xff]  }
 0x11d   :  { %3899 = vmatprep.subr.bf16.mxu1 %v5673_v62 }
 0x11e   :  { %3695 = vmatpush1.bf16.msra.mxu0 %v5593_v56 }
 0x11f   :  { %3696 = vmatprep.subr.bf16.mxu0 %v5601_v57 }
 0x120   :  { %3900 = vmatpush1.bf16.msra.mxu1 %v5671_v3  ;;  %v5638_v3 = vld [vmem:[%s7756_s4 + $0x468] ss:$12 sps:$4 sm:$0xff]  }
 0x121   :  { %5055 = vmatprep.subr.bf16.mxu1 %v5677_v9  ;;  %v5643_v9 = vld [vmem:[%s7756_s4 + $0x484] ss:$12 sps:$4 sm:$0xff]  }
 0x122   :  { %3697 = vmatpush1.bf16.msra.mxu0 %v5599_v60 }
 0x123   :  { %3698 = vmatprep.subr.bf16.mxu0 %v5607_v61 }
 0x124   :  { %v6736_v1 = vpop.f32.mrb[4].mxu1 }
 0x125   :  { %v1020_v8 = vpop.f32.mrb[5].mxu1 }
 0x126   :  { %3699 = vmatpush1.bf16.msra.mxu0 %v5605_v63  ;;  %v1022_v11 = vpop.f32.mrb[6].mxu1  ;;  %v977_v21 = vpop.f32.mrb[4].mxu0  ;;  %v1021_v49 = vadd.f32 %v1020_v8, %v209_v45 }
 0x127   :  { %3700 = vmatprep.subr.bf16.mxu0 %v5613_v0  ;;  %v1023_v31 = vpop.f32.mrb[7].mxu1  ;;  %v979_v23 = vpop.f32.mrb[5].mxu0  ;;  %v978_v47 = vadd.f32 %v977_v21, %v197_v44  ;;  %v5641_v11 = vld [vmem:[%s7756_s4 + $0x480] ss:$12 sps:$4 sm:$0xff]   ;;  %v5668_v44 = vld [vmem:[%s7756_s4 + $0x510] ss:$12 sps:$4 sm:$0xff]  }
 0x128   :  { %v980_v24 = vadd.f32 %v979_v23, %v201_v18  ;;  %v981_v25 = vpop.f32.mrb[6].mxu0  ;;  %v1210_v55 = vmin.f32 %v1021_v49, 0.0  ;;  %v1195_v63 = vmax.f32 %v1021_v49, 0.0  ;;  %v5649_v23 = vld [vmem:[%s7756_s4 + $0x4b4] ss:$12 sps:$4 sm:$0xff]  }
 0x129   :  { %v982_v26 = vpop.f32.mrb[7].mxu0  ;;  %v1207_v54 = vmin.f32 %v978_v47, 0.0  ;;  %v1192_v60 = vmax.f32 %v978_v47, 0.0  ;;  %v5652_v25 = vld [vmem:[%s7756_s4 + $0x4cc] ss:$12 sps:$4 sm:$0xff]  }
 0x12a   :  { %3701 = vmatpush1.bf16.msra.mxu0 %v5611_v10  ;;  %v1193_v29 = vmax.f32 %v980_v24, 0.0  ;;  %v1208_v30 = vmin.f32 %v980_v24, 0.0  ;;  %v1226_v0 = vmul.f32 %v6653_v13, %v1210_v55  ;;  %v5647_v24 = vld [vmem:[%s7756_s4 + $0x4b0] ss:$12 sps:$4 sm:$0xff]   ;;  %v5650_v26 = vld [vmem:[%s7756_s4 + $0x4c8] ss:$12 sps:$4 sm:$0xff]  }
 0x12b   :  { %3702 = vmatprep.subr.bf16.mxu0 %v5616_v12  ;;  %v1223_v61 = vmul.f32 %v6653_v13, %v1207_v54  ;;  %v5681_v55 = vld [vmem:[%s7756_s4 + $0x544] ss:$12 sps:$4 sm:$0xff]  }
 0x12c   :  { %v1224_v34 = vmul.f32 %v6653_v13, %v1208_v30  ;;  %v1241_v10 = vadd.f32 %v1226_v0, %v1195_v63  ;;  %v5656_v30 = vld [vmem:[%s7756_s4 + $0x4e0] ss:$12 sps:$4 sm:$0xff]  }
 0x12d   :  { %v1238_v8 = vadd.f32 %v1223_v61, %v1192_v60  ;;  %v5682_v60 = vld [vmem:[%s7756_s4 + $0xe0] ss:$12 sps:$4 sm:$0xff]  }
 0x12e   :  { %3703 = vmatpush1.bf16.msra.mxu0 %v5614_v15  ;;  %v1239_v38 = vadd.f32 %v1224_v34, %v1193_v29  ;;  %v5646_v15 = vld [vmem:[%s7756_s4 + $0x49c] ss:$12 sps:$4 sm:$0xff]   ;;  %v6836_v18 = vpack.c.bf16 %v1241_v10, %v1241_v10  ;;  %v204_v29 = vsub.s32 6, %v6637_v4  ;;  %v5679_v61 = vld [vmem:[%s7756_s4 + $0x540] ss:$12 sps:$4 sm:$0xff]  }
 0x12f   :  { %3704 = vmatprep.subr.bf16.mxu0 %v5619_v16  ;;  %v6829_v31 = vpack.c.bf16 %v1238_v8, %v1238_v8  ;;  %v6868_v34 = vld [vmem:[%s7755_s3 + $0x8] sm:$0x7f]  ;;  %v5687_v8 = vld [vmem:[%s7756_s4 + $0xf8] ss:$12 sps:$4 sm:$0xff]  }
 0x130   :  { %v6781_v41 = vpack.c.bf16 %v1239_v38, %v1239_v38  ;;  %v5670_v38 = vld [vmem:[%s7756_s4 + $0x514] ss:$12 sps:$4 sm:$0xff]   ;;  %v5684_v10 = vld [vmem:[%s7756_s4 + $0x558] ss:$12 sps:$4 sm:$0xff]  }
 0x131   :  { %v5683_v0 = vld [vmem:[%s7756_s4 + $0x20] ss:$12 sps:$4 sm:$0xff]   ;;  %v5938_v4 = vld [vmem:[%s7756_s4 + $0x968] ss:$12 sps:$4 sm:$0xff]  }
 0x132   :  { %3705 = vmatpush1.bf16.msra.mxu0 %v5617_v20  ;;  %3720 = vmatprep.mubr.bf16.mxu0 %v6781_v41 }
 0x133   :  { %3706 = vmatprep.subr.bf16.mxu0 %v5622_v22  ;;  %v5644_v22 = vld [vmem:[%s7756_s4 + $0x498] ss:$12 sps:$4 sm:$0xff]  }
 0x136   :  { %3707 = vmatpush1.bf16.msra.mxu0 %v5620_v27  ;;  %v5658_v27 = vld [vmem:[%s7756_s4 + $0x4e4] ss:$12 sps:$4 sm:$0xff]  }
 0x137   :  { %3708 = vmatprep.subr.bf16.mxu0 %v5625_v33  ;;  %v5664_v33 = vld [vmem:[%s7756_s4 + $0x4fc] ss:$12 sps:$4 sm:$0xff]  }
 0x13a   :  { %3709 = vmatpush1.bf16.msra.mxu0 %v5623_v36  ;;  %v237_v36 = vrot.slane %v6868_v34, %v204_v29 }
 0x13b   :  { %3710 = vmatprep.subr.bf16.mxu0 %v5628_v37  ;;  %v5662_v37 = vld [vmem:[%s7756_s4 + $0x4f8] ss:$12 sps:$4 sm:$0xff]  }
 0x13e   :  { %3711 = vmatpush1.bf16.msra.mxu0 %v5626_v42 }
 0x13f   :  { %3712 = vmatprep.subr.bf16.mxu0 %v5631_v43 }
 0x142   :  { %3713 = vmatpush1.bf16.msra.mxu0 %v5629_v46 }
 0x143   :  { %3714 = vmatprep.subr.bf16.mxu0 %v5634_v48  ;;  %v5676_v48 = vld [vmem:[%s7756_s4 + $0x52c] ss:$12 sps:$4 sm:$0xff]  }
 0x144   :  { %v6806_v56 = vpop.f32.mrb[8].mxu1 }
 0x145   :  { %v6808_v57 = vpop.f32.mrb[9].mxu1 }
 0x146   :  { %3715 = vmatpush1.bf16.msra.mxu0 %v5632_v50  ;;  %v1104_v59 = vpop.f32.mrb[10].mxu1  ;;  %v6827_v12 = vpop.f32.mrb[8].mxu0 }
 0x147   :  { %3716 = vmatprep.subr.bf16.mxu0 %v5637_v51  ;;  %v1105_v62 = vpop.f32.mrb[11].mxu1  ;;  %v6834_v16 = vpop.f32.mrb[9].mxu0  ;;  %v5674_v51 = vld [vmem:[%s7756_s4 + $0x528] ss:$12 sps:$4 sm:$0xff]  }
 0x148   :  { %v1063_v20 = vpop.f32.mrb[10].mxu0  ;;  %v5686_v62 = vld [vmem:[%s7756_s4 + $0x55c] ss:$12 sps:$4 sm:$0xff]  }
 0x149   :  { %v1064_v21 = vpop.f32.mrb[11].mxu0  ;;  %v5689_v20 = vld [vmem:[%s7756_s4 + $0x570] ss:$12 sps:$4 sm:$0xff]  }
 0x14a   :  { %3717 = vmatpush1.bf16.msra.mxu0 %v5635_v58  ;;  %v5678_v58 = vld [vmem:[%s7756_s4 + $0x8] ss:$12 sps:$4 sm:$0xff]   ;;  %v5696_v21 = vld [vmem:[%s7756_s4 + $0x58c] ss:$12 sps:$4 sm:$0xff]  }
 0x14b   :  { %3718 = vmatprep.subr.bf16.mxu0 %v5640_v2 }
 0x14e   :  { %3719 = vmatpush1.bf16.msra.mxu0 %v5638_v3 }
 0x14f   :  { %3729 = vmatprep.subr.bf16.mxu0 %v5643_v9 }
 0x151   :  { %3721 = vmatmul.mubr.bf16.vlgmr.msra.gmra.mrb[16].mxu0 %v6829_v31 }
 0x152   :  { %3730 = vmatpush1.bf16.msra.mxu0 %v5641_v11  ;;  %3761 = vmatprep.mubr.bf16.mxu0 %v6836_v18  ;;  %v5688_v11 = vld [vmem:[%s7756_s4 + $0x38] ss:$12 sps:$4 sm:$0xff]  }
 0x153   :  { %3731 = vmatprep.subr.bf16.mxu0 %v5646_v15  ;;  %v5692_v15 = vld [vmem:[%s7756_s4 + $0x110] ss:$12 sps:$4 sm:$0xff]  }
 0x156   :  { %3732 = vmatpush1.bf16.msra.mxu0 %v5644_v22  ;;  %v5693_v22 = vld [vmem:[%s7756_s4 + $0x50] ss:$12 sps:$4 sm:$0xff]  }
 0x157   :  { %3733 = vmatprep.subr.bf16.mxu0 %v5649_v23  ;;  %v5697_v23 = vld [vmem:[%s7756_s4 + $0x128] ss:$12 sps:$4 sm:$0xff]  }
 0x15a   :  { %3734 = vmatpush1.bf16.msra.mxu0 %v5647_v24  ;;  %v5694_v24 = vld [vmem:[%s7756_s4 + $0x588] ss:$12 sps:$4 sm:$0xff]  }
 0x15b   :  { %3735 = vmatprep.subr.bf16.mxu0 %v5652_v25  ;;  %v205_v25 = vrot.slane %v6645_v6, %v204_v29  ;;  %v5699_v6 = vld [vmem:[%s7756_s4 + $0x5a0] ss:$12 sps:$4 sm:$0xff]  }
 0x15d   :  { %v1019_v29 = vadd.f32 %v6736_v1, %v205_v25  ;;  %v5704_v1 = vld [vmem:[%s7756_s4 + $0x5b8] ss:$12 sps:$4 sm:$0xff]   ;;  %v5737_v25 = vld [vmem:[%s7756_s4 + $0x2a8] ss:$12 sps:$4 sm:$0xff]  }
 0x15e   :  { %3736 = vmatpush1.bf16.msra.mxu0 %v5650_v26  ;;  %v5701_v26 = vld [vmem:[%s7756_s4 + $0x5a4] ss:$12 sps:$4 sm:$0xff]  }
 0x15f   :  { %3737 = vmatprep.subr.bf16.mxu0 %v5658_v27  ;;  %v5698_v27 = vld [vmem:[%s7756_s4 + $0x68] ss:$12 sps:$4 sm:$0xff]  }
 0x162   :  { %3738 = vmatpush1.bf16.msra.mxu0 %v5656_v30  ;;  %v217_v30 = vrot.slane %v6868_v34, %v6659_v19 }
 0x163   :  { %3739 = vmatprep.subr.bf16.mxu0 %v5664_v33  ;;  %v5702_v33 = vld [vmem:[%s7756_s4 + $0x140] ss:$12 sps:$4 sm:$0xff]  }
 0x164   :  { %v1182_v40 = vpop.f32.mrb[12].mxu1 }
 0x165   :  { %v1183_v42 = vadd.f32 %v1182_v40, %v237_v36  ;;  %v5261_v43 = vpop.f32.mrb[13].mxu1  ;;  %v5706_v36 = vld [vmem:[%s7756_s4 + $0x5bc] ss:$12 sps:$4 sm:$0xff]   ;;  %v5707_v40 = vld [vmem:[%s7756_s4 + $0x158] ss:$12 sps:$4 sm:$0xff]  }
 0x166   :  { %3740 = vmatpush1.bf16.msra.mxu0 %v5662_v37  ;;  %v1185_v45 = vpop.f32.mrb[14].mxu1  ;;  %v6903_v2 = vpop.f32.mrb[12].mxu0  ;;  %v1062_v37 = vadd.f32 %v6834_v16, %v217_v30  ;;  %v5711_v16 = vld [vmem:[%s7756_s4 + $0x5d4] ss:$12 sps:$4 sm:$0xff]  }
 0x167   :  { %v1202_v46 = vmax.f32 %v1183_v42, 0.0  ;;  %v1217_v47 = vmin.f32 %v1183_v42, 0.0  ;;  %3741 = vmatprep.subr.bf16.mxu0 %v5670_v38  ;;  %v5262_v49 = vpop.f32.mrb[15].mxu1  ;;  %v6910_v63 = vpop.f32.mrb[13].mxu0  ;;  %v5703_v38 = vld [vmem:[%s7756_s4 + $0x80] ss:$12 sps:$4 sm:$0xff]  }
 0x168   :  { %v1145_v3 = vpop.f32.mrb[14].mxu0  ;;  %v1209_v42 = vmin.f32 %v1019_v29, 0.0  ;;  %v1212_v43 = vmin.f32 %v1062_v37, 0.0  ;;  %v5712_v45 = vld [vmem:[%s7756_s4 + $0x170] ss:$12 sps:$4 sm:$0xff]  }
 0x169   :  { %v1233_v50 = vmul.f32 %v6653_v13, %v1217_v47  ;;  %v1146_v9 = vpop.f32.mrb[15].mxu0  ;;  %v1194_v47 = vmax.f32 %v1019_v29, 0.0  ;;  %v5716_v49 = vld [vmem:[%s7756_s4 + $0x5ec] ss:$12 sps:$4 sm:$0xff]   ;;  %v5738_v30 = vld [vmem:[%s7756_s4 + $0x1e8] ss:$12 sps:$4 sm:$0xff]  }
 0x16a   :  { %3742 = vmatpush1.bf16.msra.mxu0 %v5668_v44  ;;  %v5708_v44 = vld [vmem:[%s7756_s4 + $0x98] ss:$12 sps:$4 sm:$0xff]   ;;  %v5722_v3 = vld [vmem:[%s7756_s4 + $0x260] ss:$12 sps:$4 sm:$0xff]   ;;  %v5746_v29 = vld [vmem:[%s7756_s4 + $0x67c] ss:$12 sps:$4 sm:$0xff]  }
 0x16b   :  { %v1248_v54 = vadd.f32 %v1233_v50, %v1202_v46  ;;  %3743 = vmatprep.subr.bf16.mxu0 %v5676_v48  ;;  %v5709_v46 = vld [vmem:[%s7756_s4 + $0x5d0] ss:$12 sps:$4 sm:$0xff]   ;;  %v1225_v48 = vmul.f32 %v6653_v13, %v1209_v42  ;;  %v1197_v50 = vmax.f32 %v1062_v37, 0.0  ;;  %v5747_v37 = vld [vmem:[%s7756_s4 + $0x2d8] ss:$12 sps:$4 sm:$0xff]  }
 0x16c   :  { %v5752_v42 = vld [vmem:[%s7756_s4 + $0x2f0] ss:$12 sps:$4 sm:$0xff]  }
 0x16d   :  { %v6895_v59 = vpack.c.bf16 %v1248_v54, %v1248_v54  ;;  %v5713_v54 = vld [vmem:[%s7756_s4 + $0xb0] ss:$12 sps:$4 sm:$0xff]  }
 0x16e   :  { %3744 = vmatpush1.bf16.msra.mxu0 %v5674_v51  ;;  %v1228_v51 = vmul.f32 %v6653_v13, %v1212_v43  ;;  %v5756_v43 = vld [vmem:[%s7756_s4 + $0x6ac] ss:$12 sps:$4 sm:$0xff]  }
 0x16f   :  { %5019 = vmatmul.mubr.msk.bf16.vlgmr.msra.gmra.mrb[20].mxu1 %vm3602_vm1, %v6895_v59  ;;  %3745 = vmatprep.subr.bf16.mxu0 %v5681_v55  ;;  %v5717_v55 = vld [vmem:[%s7756_s4 + $0x248] ss:$12 sps:$4 sm:$0xff]  }
 0x170   :  { %5056 = vmatpush3.bf16.msra.mxu1 %v5678_v58  ;;  %3966 = vmatprep.mubr.bf16.mxu1 %v6695_v53  ;;  %v5691_v53 = vld [vmem:[%s7756_s4 + $0x574] ss:$12 sps:$4 sm:$0xff]  }
 0x171   :  { %5057 = vmatprep.subr.bf16.mxu1 %v5682_v60  ;;  %v5714_v58 = vld [vmem:[%s7756_s4 + $0x5e8] ss:$12 sps:$4 sm:$0xff]   ;;  %v1240_v60 = vadd.f32 %v1225_v48, %v1194_v47  ;;  %v5761_v47 = vld [vmem:[%s7756_s4 + $0x6c4] ss:$12 sps:$4 sm:$0xff]  }
 0x172   :  { %3746 = vmatpush1.bf16.msra.mxu0 %v5679_v61  ;;  %v5721_v61 = vld [vmem:[%s7756_s4 + $0x604] ss:$12 sps:$4 sm:$0xff]   ;;  %v5758_v48 = vld [vmem:[%s7756_s4 + $0x308] ss:$12 sps:$4 sm:$0xff]  }
 0x173   :  { %3747 = vmatprep.subr.bf16.mxu0 %v5686_v62  ;;  %v5718_v62 = vld [vmem:[%s7756_s4 + $0x188] ss:$12 sps:$4 sm:$0xff]   ;;  %v7015_v9 = vpack.c.bf16 %v1240_v60, %v1240_v60  ;;  %v5772_v60 = vld [vmem:[%s7756_s4 + $0x410] ss:$12 sps:$4 sm:$0xff]  }
 0x174   :  { %5058 = vmatpush3.bf16.msra.mxu1 %v5683_v0  ;;  %v1243_v0 = vadd.f32 %v1228_v51, %v1197_v50  ;;  %v5759_v50 = vld [vmem:[%s7756_s4 + $0x6c0] ss:$12 sps:$4 sm:$0xff]   ;;  %v5766_v51 = vld [vmem:[%s7756_s4 + $0x6dc] ss:$12 sps:$4 sm:$0xff]  }
 0x175   :  { %5059 = vmatprep.subr.bf16.mxu1 %v5687_v8  ;;  %v5719_v8 = vld [vmem:[%s7756_s4 + $0x600] ss:$12 sps:$4 sm:$0xff]  }
 0x176   :  { %3748 = vmatpush1.bf16.msra.mxu0 %v5684_v10  ;;  %v5726_v10 = vld [vmem:[%s7756_s4 + $0x61c] ss:$12 sps:$4 sm:$0xff]  }
 0x177   :  { %3749 = vmatprep.subr.bf16.mxu0 %v5691_v53  ;;  %v7022_v53 = vpack.c.bf16 %v1243_v0, %v1243_v0  ;;  %v5773_v0 = vld [vmem:[%s7756_s4 + $0x350] ss:$12 sps:$4 sm:$0xff]  }
 0x178   :  { %5060 = vmatpush3.bf16.msra.mxu1 %v5688_v11  ;;  %v5723_v11 = vld [vmem:[%s7756_s4 + $0x1a0] ss:$12 sps:$4 sm:$0xff]  }
 0x179   :  { %5061 = vmatprep.subr.bf16.mxu1 %v5692_v15  ;;  %v5731_v15 = vld [vmem:[%s7756_s4 + $0x634] ss:$12 sps:$4 sm:$0xff]  }
 0x17a   :  { %3750 = vmatpush1.bf16.msra.mxu0 %v5689_v20  ;;  %v5728_v20 = vld [vmem:[%s7756_s4 + $0x1b8] ss:$12 sps:$4 sm:$0xff]  }
 0x17b   :  { %3751 = vmatprep.subr.bf16.mxu0 %v5696_v21  ;;  %v5732_v21 = vld [vmem:[%s7756_s4 + $0x290] ss:$12 sps:$4 sm:$0xff]  }
 0x17c   :  { %5062 = vmatpush3.bf16.msra.mxu1 %v5693_v22  ;;  %v5729_v22 = vld [vmem:[%s7756_s4 + $0x630] ss:$12 sps:$4 sm:$0xff]  }
 0x17d   :  { %5063 = vmatprep.subr.bf16.mxu1 %v5697_v23  ;;  %v5736_v23 = vld [vmem:[%s7756_s4 + $0x64c] ss:$12 sps:$4 sm:$0xff]  }
 0x17e   :  { %3752 = vmatpush1.bf16.msra.mxu0 %v5694_v24  ;;  %v5733_v24 = vld [vmem:[%s7756_s4 + $0x1d0] ss:$12 sps:$4 sm:$0xff]  }
 0x17f   :  { %3753 = vmatprep.subr.bf16.mxu0 %v5701_v26  ;;  %v5734_v26 = vld [vmem:[%s7756_s4 + $0x648] ss:$12 sps:$4 sm:$0xff]  }
 0x180   :  { %5064 = vmatpush3.bf16.msra.mxu1 %v5698_v27  ;;  %v5741_v27 = vld [vmem:[%s7756_s4 + $0x664] ss:$12 sps:$4 sm:$0xff]  }
 0x181   :  { %5065 = vmatprep.subr.bf16.mxu1 %v5702_v33  ;;  %v5742_v33 = vld [vmem:[%s7756_s4 + $0x2c0] ss:$12 sps:$4 sm:$0xff]  }
 0x182   :  { %3754 = vmatpush1.bf16.msra.mxu0 %v5699_v6  ;;  %v5739_v6 = vld [vmem:[%s7756_s4 + $0x660] ss:$12 sps:$4 sm:$0xff]  }
 0x183   :  { %3755 = vmatprep.subr.bf16.mxu0 %v5706_v36  ;;  %v5743_v36 = vld [vmem:[%s7756_s4 + $0x200] ss:$12 sps:$4 sm:$0xff]  }
 0x184   :  { %5066 = vmatpush3.bf16.msra.mxu1 %v5703_v38  ;;  %v5744_v38 = vld [vmem:[%s7756_s4 + $0x678] ss:$12 sps:$4 sm:$0xff]  }
 0x185   :  { %5067 = vmatprep.subr.bf16.mxu1 %v5707_v40  ;;  %v5751_v40 = vld [vmem:[%s7756_s4 + $0x694] ss:$12 sps:$4 sm:$0xff]  }
 0x186   :  { %3756 = vmatpush1.bf16.msra.mxu0 %v5704_v1  ;;  %v5748_v1 = vld [vmem:[%s7756_s4 + $0x218] ss:$12 sps:$4 sm:$0xff]  }
 0x187   :  { %3757 = vmatprep.subr.bf16.mxu0 %v5711_v16  ;;  %v5749_v16 = vld [vmem:[%s7756_s4 + $0x690] ss:$12 sps:$4 sm:$0xff]  }
 0x188   :  { %5068 = vmatpush3.bf16.msra.mxu1 %v5708_v44  ;;  %v5753_v44 = vld [vmem:[%s7756_s4 + $0x230] ss:$12 sps:$4 sm:$0xff]  }
 0x189   :  { %5069 = vmatprep.subr.bf16.mxu1 %v5712_v45  ;;  %v5757_v45 = vld [vmem:[%s7756_s4 + $0x3c8] ss:$12 sps:$4 sm:$0xff]  }
 0x18a   :  { %3758 = vmatpush1.bf16.msra.mxu0 %v5709_v46  ;;  %v5754_v46 = vld [vmem:[%s7756_s4 + $0x6a8] ss:$12 sps:$4 sm:$0xff]  }
 0x18b   :  { %3759 = vmatprep.subr.bf16.mxu0 %v5716_v49  ;;  %v5762_v49 = vld [vmem:[%s7756_s4 + $0x3e0] ss:$12 sps:$4 sm:$0xff]  }
 0x18c   :  { %5070 = vmatpush3.bf16.msra.mxu1 %v5713_v54  ;;  %v5763_v54 = vld [vmem:[%s7756_s4 + $0x320] ss:$12 sps:$4 sm:$0xff]  }
 0x18d   :  { %5077 = vmatprep.subr.bf16.mxu1 %v5717_v55  ;;  %v5767_v55 = vld [vmem:[%s7756_s4 + $0x3f8] ss:$12 sps:$4 sm:$0xff]  }
 0x18e   :  { %3760 = vmatpush1.bf16.msra.mxu0 %v5714_v58  ;;  %v5771_v58 = vld [vmem:[%s7756_s4 + $0x6f4] ss:$12 sps:$4 sm:$0xff]  }
 0x18f   :  { %3967 = vmatmul.mubr.bf16.vlgmr.msra.gmra.mrb[24].mxu1 %v6693_v52  ;;  %3770 = vmatprep.subr.bf16.mxu0 %v5721_v61  ;;  %v5727_v52 = vld [vmem:[%s7756_s4 + $0x278] ss:$12 sps:$4 sm:$0xff]   ;;  %v5769_v61 = vld [vmem:[%s7756_s4 + $0x6f0] ss:$12 sps:$4 sm:$0xff]  }
 0x190   :  { %5078 = vmatpush3.bf16.msra.mxu1 %v5718_v62  ;;  %4006 = vmatprep.mubr.bf16.mxu1 %v6667_v28  ;;  %v5724_v28 = vld [vmem:[%s7756_s4 + $0x618] ss:$12 sps:$4 sm:$0xff]  }
 0x191   :  { %3762 = vmatmul.mubr.bf16.vlgmr.msra.gmra.mrb[16].mxu0 %v7015_v9  ;;  %5079 = vmatprep.subr.bf16.mxu1 %v5722_v3  ;;  %v5776_v62 = vld [vmem:[%s7756_s4 + $0x70c] ss:$12 sps:$4 sm:$0xff]   ;;  %v5777_v3 = vld [vmem:[%s7756_s4 + $0x428] ss:$12 sps:$4 sm:$0xff]  }
 0x192   :  { %3771 = vmatpush1.bf16.msra.mxu0 %v5719_v8  ;;  %3802 = vmatprep.mubr.bf16.mxu0 %v7022_v53  ;;  %v5774_v8 = vld [vmem:[%s7756_s4 + $0x708] ss:$12 sps:$4 sm:$0xff]  }
 0x193   :  { %3772 = vmatprep.subr.bf16.mxu0 %v5726_v10  ;;  %v213_v10 = vrot.slane %v6868_v34, %v6656_v17 }
 0x194   :  { %5080 = vmatpush3.bf16.msra.mxu1 %v5723_v11  ;;  %v5781_v11 = vld [vmem:[%s7756_s4 + $0x724] ss:$12 sps:$4 sm:$0xff]  }
 0x195   :  { %5081 = vmatprep.subr.bf16.mxu1 %v5727_v52  ;;  %v225_v52 = vrot.slane %v6868_v34, %v192_v7  ;;  %v5786_v7 = vld [vmem:[%s7756_s4 + $0x73c] ss:$12 sps:$4 sm:$0xff]  }
 0x196   :  { %3773 = vmatpush1.bf16.msra.mxu0 %v5724_v28  ;;  %v5778_v28 = vld [vmem:[%s7756_s4 + $0x368] ss:$12 sps:$4 sm:$0xff]  }
 0x197   :  { %3774 = vmatprep.subr.bf16.mxu0 %v5731_v15  ;;  %v5782_v15 = vld [vmem:[%s7756_s4 + $0x440] ss:$12 sps:$4 sm:$0xff]  }
 0x198   :  { %5082 = vmatpush3.bf16.msra.mxu1 %v5728_v20  ;;  %v5779_v20 = vld [vmem:[%s7756_s4 + $0x720] ss:$12 sps:$4 sm:$0xff]  }
 0x199   :  { %5083 = vmatprep.subr.bf16.mxu1 %v5732_v21  ;;  %v1060_v21 = vadd.f32 %v6827_v12, %v213_v10  ;;  %v5784_v12 = vld [vmem:[%s7756_s4 + $0x738] ss:$12 sps:$4 sm:$0xff]   ;;  %v5819_v10 = vld [vmem:[%s7756_s4 + $0x7e0] ss:$12 sps:$4 sm:$0xff]  }
 0x19a   :  { %3775 = vmatpush1.bf16.msra.mxu0 %v5729_v22  ;;  %v1103_v22 = vadd.f32 %v6808_v57, %v225_v52  ;;  %v5791_v57 = vld [vmem:[%s7756_s4 + $0x754] ss:$12 sps:$4 sm:$0xff]  }
 0x19b   :  { %3776 = vmatprep.subr.bf16.mxu0 %v5736_v23  ;;  %v5783_v23 = vld [vmem:[%s7756_s4 + $0x380] ss:$12 sps:$4 sm:$0xff]  }
 0x19c   :  { %5084 = vmatpush3.bf16.msra.mxu1 %v5733_v24  ;;  %v5787_v24 = vld [vmem:[%s7756_s4 + $0x458] ss:$12 sps:$4 sm:$0xff]   ;;  %v5823_v52 = vld [vmem:[%s7756_s4 + $0x500] ss:$12 sps:$4 sm:$0xff]  }
 0x19d   :  { %5085 = vmatprep.subr.bf16.mxu1 %v5737_v25  ;;  %v1211_v25 = vmin.f32 %v1060_v21, 0.0 }
 0x19e   :  { %3777 = vmatpush1.bf16.msra.mxu0 %v5734_v26  ;;  %v1214_v26 = vmin.f32 %v1103_v22, 0.0 }
 0x19f   :  { %3778 = vmatprep.subr.bf16.mxu0 %v5741_v27  ;;  %v5788_v27 = vld [vmem:[%s7756_s4 + $0x398] ss:$12 sps:$4 sm:$0xff]  }
 0x1a0   :  { %5086 = vmatpush3.bf16.msra.mxu1 %v5738_v30  ;;  %v5792_v30 = vld [vmem:[%s7756_s4 + $0x470] ss:$12 sps:$4 sm:$0xff]  }
 0x1a1   :  { %5087 = vmatprep.subr.bf16.mxu1 %v5742_v33  ;;  %v5789_v33 = vld [vmem:[%s7756_s4 + $0x750] ss:$12 sps:$4 sm:$0xff]  }
 0x1a2   :  { %3779 = vmatpush1.bf16.msra.mxu0 %v5739_v6  ;;  %v1196_v6 = vmax.f32 %v1060_v21, 0.0  ;;  %v5828_v21 = vld [vmem:[%s7756_s4 + $0x518] ss:$12 sps:$4 sm:$0xff]  }
 0x1a3   :  { %3780 = vmatprep.subr.bf16.mxu0 %v5746_v29  ;;  %v1227_v29 = vmul.f32 %v6653_v13, %v1211_v25  ;;  %v5834_v25 = vld [vmem:[%s7756_s4 + $0x828] ss:$12 sps:$4 sm:$0xff]  }
 0x1a4   :  { %5088 = vmatpush3.bf16.msra.mxu1 %v5743_v36  ;;  %v5796_v36 = vld [vmem:[%s7756_s4 + $0x76c] ss:$12 sps:$4 sm:$0xff]  }
 0x1a5   :  { %5089 = vmatprep.subr.bf16.mxu1 %v5747_v37  ;;  %v1199_v37 = vmax.f32 %v1103_v22, 0.0  ;;  %v5829_v22 = vld [vmem:[%s7756_s4 + $0x810] ss:$12 sps:$4 sm:$0xff]  }
 0x1a6   :  { %3781 = vmatpush1.bf16.msra.mxu0 %v5744_v38  ;;  %v1230_v38 = vmul.f32 %v6653_v13, %v1214_v26  ;;  %v5838_v26 = vld [vmem:[%s7756_s4 + $0x608] ss:$12 sps:$4 sm:$0xff]  }
 0x1a7   :  { %3782 = vmatprep.subr.bf16.mxu0 %v5751_v40  ;;  %v5793_v40 = vld [vmem:[%s7756_s4 + $0x3b0] ss:$12 sps:$4 sm:$0xff]  }
 0x1a8   :  { %5090 = vmatpush3.bf16.msra.mxu1 %v5748_v1  ;;  %v5797_v1 = vld [vmem:[%s7756_s4 + $0x548] ss:$12 sps:$4 sm:$0xff]  }
 0x1a9   :  { %5091 = vmatprep.subr.bf16.mxu1 %v5752_v42  ;;  %v5794_v42 = vld [vmem:[%s7756_s4 + $0x768] ss:$12 sps:$4 sm:$0xff]  }
 0x1aa   :  { %3783 = vmatpush1.bf16.msra.mxu0 %v5749_v16  ;;  %v1242_v16 = vadd.f32 %v1227_v29, %v1196_v6  ;;  %v5846_v6 = vld [vmem:[%s7756_s4 + $0x85c] ss:$12 sps:$4 sm:$0xff]  }
 0x1ab   :  { %3784 = vmatprep.subr.bf16.mxu0 %v5756_v43  ;;  %v5801_v43 = vld [vmem:[%s7756_s4 + $0x784] ss:$12 sps:$4 sm:$0xff]  }
 0x1ac   :  { %5092 = vmatpush3.bf16.msra.mxu1 %v5753_v44  ;;  %v5798_v44 = vld [vmem:[%s7756_s4 + $0x488] ss:$12 sps:$4 sm:$0xff]  }
 0x1ad   :  { %5099 = vmatprep.subr.bf16.mxu1 %v5757_v45  ;;  %v1245_v45 = vadd.f32 %v1230_v38, %v1199_v37 }
 0x1ae   :  { %3785 = vmatpush1.bf16.msra.mxu0 %v5754_v46  ;;  %v5802_v46 = vld [vmem:[%s7756_s4 + $0x560] ss:$12 sps:$4 sm:$0xff]  }
 0x1af   :  { %4007 = vmatmul.mubr.bf16.vlgmr.msra.gmra.mrb[28].mxu1 %v6672_v32  ;;  %3786 = vmatprep.subr.bf16.mxu0 %v5761_v47  ;;  %v5764_v32 = vld [vmem:[%s7756_s4 + $0x6d8] ss:$12 sps:$4 sm:$0xff]   ;;  %v5799_v47 = vld [vmem:[%s7756_s4 + $0x780] ss:$12 sps:$4 sm:$0xff]  }
 0x1b0   :  { %5100 = vmatpush3.bf16.msra.mxu1 %v5758_v48  ;;  %4046 = vmatprep.mubr.bf16.mxu1 %v6781_v41  ;;  %v5768_v41 = vld [vmem:[%s7756_s4 + $0x338] ss:$12 sps:$4 sm:$0xff]   ;;  %v7226_v48 = vpack.c.bf16 %v1242_v16, %v1242_v16  ;;  %v5849_v16 = vld [vmem:[%s7756_s4 + $0x870] ss:$12 sps:$4 sm:$0xff]  }
 0x1b1   :  { %5101 = vmatprep.subr.bf16.mxu1 %v5762_v49  ;;  %v5806_v49 = vld [vmem:[%s7756_s4 + $0x79c] ss:$12 sps:$4 sm:$0xff]  }
 0x1b2   :  { %3787 = vmatpush1.bf16.msra.mxu0 %v5759_v50  ;;  %v7233_v50 = vpack.c.bf16 %v1245_v45, %v1245_v45  ;;  %v5857_v45 = vld [vmem:[%s7756_s4 + $0x728] ss:$12 sps:$4 sm:$0xff]  }
 0x1b3   :  { %3788 = vmatprep.subr.bf16.mxu0 %v5766_v51  ;;  %v5803_v51 = vld [vmem:[%s7756_s4 + $0x4a0] ss:$12 sps:$4 sm:$0xff]  }
 0x1b4   :  { %5102 = vmatpush3.bf16.msra.mxu1 %v5763_v54  ;;  %v5811_v54 = vld [vmem:[%s7756_s4 + $0x7b4] ss:$12 sps:$4 sm:$0xff]  }
 0x1b5   :  { %5103 = vmatprep.subr.bf16.mxu1 %v5767_v55  ;;  %v5808_v55 = vld [vmem:[%s7756_s4 + $0x4b8] ss:$12 sps:$4 sm:$0xff]  }
 0x1b6   :  { %3789 = vmatpush1.bf16.msra.mxu0 %v5764_v32  ;;  %v5812_v32 = vld [vmem:[%s7756_s4 + $0x590] ss:$12 sps:$4 sm:$0xff]  }
 0x1b7   :  { %3790 = vmatprep.subr.bf16.mxu0 %v5771_v58  ;;  %v5809_v58 = vld [vmem:[%s7756_s4 + $0x7b0] ss:$12 sps:$4 sm:$0xff]  }
 0x1b8   :  { %5104 = vmatpush3.bf16.msra.mxu1 %v5768_v41  ;;  %v5816_v41 = vld [vmem:[%s7756_s4 + $0x7cc] ss:$12 sps:$4 sm:$0xff]  }
 0x1b9   :  { %5105 = vmatprep.subr.bf16.mxu1 %v5772_v60  ;;  %v5813_v60 = vld [vmem:[%s7756_s4 + $0x4d0] ss:$12 sps:$4 sm:$0xff]  }
 0x1ba   :  { %3791 = vmatpush1.bf16.msra.mxu0 %v5769_v61  ;;  %v5817_v61 = vld [vmem:[%s7756_s4 + $0x5a8] ss:$12 sps:$4 sm:$0xff]  }
 0x1bb   :  { %3792 = vmatprep.subr.bf16.mxu0 %v5776_v62  ;;  %v5814_v62 = vld [vmem:[%s7756_s4 + $0x7c8] ss:$12 sps:$4 sm:$0xff]  }
 0x1bc   :  { %5106 = vmatpush3.bf16.msra.mxu1 %v5773_v0  ;;  %v5821_v0 = vld [vmem:[%s7756_s4 + $0x7e4] ss:$12 sps:$4 sm:$0xff]  }
 0x1bd   :  { %5107 = vmatprep.subr.bf16.mxu1 %v5777_v3  ;;  %v5818_v3 = vld [vmem:[%s7756_s4 + $0x4e8] ss:$12 sps:$4 sm:$0xff]  }
 0x1be   :  { %3793 = vmatpush1.bf16.msra.mxu0 %v5774_v8  ;;  %v5822_v8 = vld [vmem:[%s7756_s4 + $0x5c0] ss:$12 sps:$4 sm:$0xff]  }
 0x1bf   :  { %3794 = vmatprep.subr.bf16.mxu0 %v5781_v11  ;;  %v5826_v11 = vld [vmem:[%s7756_s4 + $0x7fc] ss:$12 sps:$4 sm:$0xff]  }
 0x1c0   :  { %5108 = vmatpush3.bf16.msra.mxu1 %v5778_v28  ;;  %v5827_v28 = vld [vmem:[%s7756_s4 + $0x5d8] ss:$12 sps:$4 sm:$0xff]  }
 0x1c1   :  { %5109 = vmatprep.subr.bf16.mxu1 %v5782_v15  ;;  %v5824_v15 = vld [vmem:[%s7756_s4 + $0x7f8] ss:$12 sps:$4 sm:$0xff]  }
 0x1c2   :  { %3795 = vmatpush1.bf16.msra.mxu0 %v5779_v20  ;;  %v5831_v20 = vld [vmem:[%s7756_s4 + $0x814] ss:$12 sps:$4 sm:$0xff]  }
 0x1c3   :  { %3796 = vmatprep.subr.bf16.mxu0 %v5786_v7  ;;  %v5832_v7 = vld [vmem:[%s7756_s4 + $0x5f0] ss:$12 sps:$4 sm:$0xff]  }
 0x1c4   :  { %5110 = vmatpush3.bf16.msra.mxu1 %v5783_v23  ;;  %v5836_v23 = vld [vmem:[%s7756_s4 + $0x82c] ss:$12 sps:$4 sm:$0xff]  }
 0x1c5   :  { %5111 = vmatprep.subr.bf16.mxu1 %v5787_v24  ;;  %v5833_v24 = vld [vmem:[%s7756_s4 + $0x530] ss:$12 sps:$4 sm:$0xff]  }
 0x1c6   :  { %3797 = vmatpush1.bf16.msra.mxu0 %v5784_v12  ;;  %v5837_v12 = vld [vmem:[%s7756_s4 + $0x6c8] ss:$12 sps:$4 sm:$0xff]  }
 0x1c7   :  { %3798 = vmatprep.subr.bf16.mxu0 %v5791_v57  ;;  %v5841_v57 = vld [vmem:[%s7756_s4 + $0x844] ss:$12 sps:$4 sm:$0xff]  }
 0x1c8   :  { %5112 = vmatpush3.bf16.msra.mxu1 %v5788_v27  ;;  %v5842_v27 = vld [vmem:[%s7756_s4 + $0x6e0] ss:$12 sps:$4 sm:$0xff]  }
 0x1c9   :  { %5113 = vmatprep.subr.bf16.mxu1 %v5792_v30  ;;  %v5839_v30 = vld [vmem:[%s7756_s4 + $0x840] ss:$12 sps:$4 sm:$0xff]  }
 0x1ca   :  { %3799 = vmatpush1.bf16.msra.mxu0 %v5789_v33 }
 0x1cb   :  { %3800 = vmatprep.subr.bf16.mxu0 %v5796_v36  ;;  %v5843_v36 = vld [vmem:[%s7756_s4 + $0x620] ss:$12 sps:$4 sm:$0xff]  }
 0x1cc   :  { %5114 = vmatpush3.bf16.msra.mxu1 %v5793_v40  ;;  %v5844_v40 = vld [vmem:[%s7756_s4 + $0x858] ss:$12 sps:$4 sm:$0xff]  }
 0x1cd   :  { %5121 = vmatprep.subr.bf16.mxu1 %v5797_v1  ;;  %v5848_v1 = vld [vmem:[%s7756_s4 + $0x638] ss:$12 sps:$4 sm:$0xff]  }
 0x1ce   :  { %3801 = vmatpush1.bf16.msra.mxu0 %v5794_v42  ;;  %v5852_v42 = vld [vmem:[%s7756_s4 + $0x710] ss:$12 sps:$4 sm:$0xff]  }
 0x1cf   :  { %4047 = vmatmul.mubr.bf16.vlgmr.msra.gmra.mrb[32].mxu1 %v6829_v31  ;;  %3811 = vmatprep.subr.bf16.mxu0 %v5801_v43  ;;  %v5807_v31 = vld [vmem:[%s7756_s4 + $0x578] ss:$12 sps:$4 sm:$0xff]  }
 0x1d0   :  { %5122 = vmatpush3.bf16.msra.mxu1 %v5798_v44  ;;  %4086 = vmatprep.mubr.bf16.mxu1 %v6836_v18  ;;  %v5804_v18 = vld [vmem:[%s7756_s4 + $0x798] ss:$12 sps:$4 sm:$0xff]   ;;  %v5853_v44 = vld [vmem:[%s7756_s4 + $0x650] ss:$12 sps:$4 sm:$0xff]  }
 0x1d1   :  { %3803 = vmatmul.mubr.bf16.vlgmr.msra.gmra.mrb[16].mxu0 %v7226_v48  ;;  %5123 = vmatprep.subr.bf16.mxu1 %v5802_v46  ;;  %v5856_v43 = vld [vmem:[%s7756_s4 + $0x88c] ss:$12 sps:$4 sm:$0xff]   ;;  %v5854_v46 = vld [vmem:[%s7756_s4 + $0x888] ss:$12 sps:$4 sm:$0xff]  }
 0x1d2   :  { %3812 = vmatpush1.bf16.msra.mxu0 %v5799_v47  ;;  %3843 = vmatprep.mubr.bf16.mxu0 %v7233_v50  ;;  %v221_v47 = vrot.slane %v6868_v34, %v6640_v5 }
 0x1d3   :  { %3813 = vmatprep.subr.bf16.mxu0 %v5806_v49  ;;  %v5861_v49 = vld [vmem:[%s7756_s4 + $0x8a4] ss:$12 sps:$4 sm:$0xff]  }
 0x1d4   :  { %5124 = vmatpush3.bf16.msra.mxu1 %v5803_v51  ;;  %v233_v51 = vrot.slane %v6868_v34, %v200_v14  ;;  %v5866_v14 = vld [vmem:[%s7756_s4 + $0x8bc] ss:$12 sps:$4 sm:$0xff]  }
 0x1d5   :  { %5125 = vmatprep.subr.bf16.mxu1 %v5807_v31  ;;  %v5858_v31 = vld [vmem:[%s7756_s4 + $0x668] ss:$12 sps:$4 sm:$0xff]  }
 0x1d6   :  { %3814 = vmatpush1.bf16.msra.mxu0 %v5804_v18  ;;  %v5862_v18 = vld [vmem:[%s7756_s4 + $0x740] ss:$12 sps:$4 sm:$0xff]  }
 0x1d7   :  { %3815 = vmatprep.subr.bf16.mxu0 %v5811_v54  ;;  %v5859_v54 = vld [vmem:[%s7756_s4 + $0x8a0] ss:$12 sps:$4 sm:$0xff]  }
 0x1d8   :  { %5126 = vmatpush3.bf16.msra.mxu1 %v5808_v55  ;;  %v1101_v55 = vadd.f32 %v6806_v56, %v221_v47  ;;  %v5864_v56 = vld [vmem:[%s7756_s4 + $0x8b8] ss:$12 sps:$4 sm:$0xff]  }
 0x1d9   :  { %5127 = vmatprep.subr.bf16.mxu1 %v5812_v32  ;;  %v1144_v32 = vadd.f32 %v6910_v63, %v233_v51  ;;  %v5871_v63 = vld [vmem:[%s7756_s4 + $0x8d4] ss:$12 sps:$4 sm:$0xff]   ;;  %v5907_v47 = vld [vmem:[%s7756_s4 + $0x8d8] ss:$12 sps:$4 sm:$0xff]  }
 0x1da   :  { %3816 = vmatpush1.bf16.msra.mxu0 %v5809_v58  ;;  %v5863_v58 = vld [vmem:[%s7756_s4 + $0x680] ss:$12 sps:$4 sm:$0xff]  }
 0x1db   :  { %3817 = vmatprep.subr.bf16.mxu0 %v5816_v41  ;;  %v5867_v41 = vld [vmem:[%s7756_s4 + $0x758] ss:$12 sps:$4 sm:$0xff]   ;;  %v5911_v51 = vld [vmem:[%s7756_s4 + $0x994] ss:$12 sps:$4 sm:$0xff]  }
 0x1dc   :  { %5128 = vmatpush3.bf16.msra.mxu1 %v5813_v60  ;;  %v1213_v60 = vmin.f32 %v1101_v55, 0.0 }
 0x1dd   :  { %5129 = vmatprep.subr.bf16.mxu1 %v5817_v61  ;;  %v1216_v61 = vmin.f32 %v1144_v32, 0.0 }
 0x1de   :  { %3818 = vmatpush1.bf16.msra.mxu0 %v5814_v62  ;;  %v5868_v62 = vld [vmem:[%s7756_s4 + $0x698] ss:$12 sps:$4 sm:$0xff]  }
 0x1df   :  { %3819 = vmatprep.subr.bf16.mxu0 %v5821_v0  ;;  %v5872_v0 = vld [vmem:[%s7756_s4 + $0x770] ss:$12 sps:$4 sm:$0xff]  }
 0x1e0   :  { %5130 = vmatpush3.bf16.msra.mxu1 %v5818_v3  ;;  %v5869_v3 = vld [vmem:[%s7756_s4 + $0x8d0] ss:$12 sps:$4 sm:$0xff]  }
 0x1e1   :  { %5131 = vmatprep.subr.bf16.mxu1 %v5822_v8  ;;  %v1198_v8 = vmax.f32 %v1101_v55, 0.0  ;;  %v5916_v55 = vld [vmem:[%s7756_s4 + $0x9ac] ss:$12 sps:$4 sm:$0xff]  }
 0x1e2   :  { %3820 = vmatpush1.bf16.msra.mxu0 %v5819_v10  ;;  %v1229_v10 = vmul.f32 %v6653_v13, %v1213_v60  ;;  %v5922_v60 = vld [vmem:[%s7756_s4 + $0x9e0] ss:$12 sps:$4 sm:$0xff]  }
 0x1e3   :  { %3821 = vmatprep.subr.bf16.mxu0 %v5826_v11  ;;  %v5876_v11 = vld [vmem:[%s7756_s4 + $0x8ec] ss:$12 sps:$4 sm:$0xff]  }
 0x1e4   :  { %5132 = vmatpush3.bf16.msra.mxu1 %v5823_v52  ;;  %v1201_v52 = vmax.f32 %v1144_v32, 0.0  ;;  %v5917_v32 = vld [vmem:[%s7756_s4 + $0x9c8] ss:$12 sps:$4 sm:$0xff]  }
 0x1e5   :  { %5133 = vmatprep.subr.bf16.mxu1 %v5827_v28  ;;  %v1232_v28 = vmul.f32 %v6653_v13, %v1216_v61  ;;  %v5926_v61 = vld [vmem:[%s7756_s4 + $0x9dc] ss:$12 sps:$4 sm:$0xff]  }
 0x1e6   :  { %3822 = vmatpush1.bf16.msra.mxu0 %v5824_v15  ;;  %v7330_v33 = vpop.f32.mrb[16].mxu1  ;;  %v5873_v15 = vld [vmem:[%s7756_s4 + $0x6b0] ss:$12 sps:$4 sm:$0xff]  }
 0x1e7   :  { %3823 = vmatprep.subr.bf16.mxu0 %v5831_v20  ;;  %v7336_v29 = vpop.f32.mrb[17].mxu1  ;;  %v5877_v20 = vld [vmem:[%s7756_s4 + $0x848] ss:$12 sps:$4 sm:$0xff]  }
 0x1e8   :  { %5134 = vmatpush3.bf16.msra.mxu1 %v5828_v21  ;;  %v3644_v37 = vpop.f32.mrb[18].mxu1  ;;  %v5874_v21 = vld [vmem:[%s7756_s4 + $0x8e8] ss:$12 sps:$4 sm:$0xff]  }
 0x1e9   :  { %5135 = vmatprep.subr.bf16.mxu1 %v5832_v7  ;;  %v3645_v38 = vpop.f32.mrb[19].mxu1  ;;  %v1244_v7 = vadd.f32 %v1229_v10, %v1198_v8  ;;  %v5892_v37 = vld [vmem:[%s7756_s4 + $0x890] ss:$12 sps:$4 sm:$0xff]   ;;  %v5931_v8 = vld [vmem:[%s7756_s4 + $0x9f4] ss:$12 sps:$4 sm:$0xff]  }
 0x1ea   :  { %3824 = vmatpush1.bf16.msra.mxu0 %v5829_v22  ;;  %v5881_v22 = vld [vmem:[%s7756_s4 + $0x904] ss:$12 sps:$4 sm:$0xff]   ;;  %v5896_v38 = vld [vmem:[%s7756_s4 + $0x94c] ss:$12 sps:$4 sm:$0xff]  }
 0x1eb   :  { %3825 = vmatprep.subr.bf16.mxu0 %v5836_v23  ;;  %v5878_v23 = vld [vmem:[%s7756_s4 + $0x788] ss:$12 sps:$4 sm:$0xff]   ;;  %v5928_v10 = vld [vmem:[%s7756_s4 + $0x938] ss:$12 sps:$4 sm:$0xff]  }
 0x1ec   :  { %5136 = vmatpush3.bf16.msra.mxu1 %v5833_v24  ;;  %v1247_v24 = vadd.f32 %v1232_v28, %v1201_v52  ;;  %v5929_v52 = vld [vmem:[%s7756_s4 + $0x9f0] ss:$12 sps:$4 sm:$0xff]   ;;  %v5936_v28 = vld [vmem:[%s7756_s4 + $0xa0c] ss:$12 sps:$4 sm:$0xff]  }
 0x1ed   :  { %5143 = vmatprep.subr.bf16.mxu1 %v5837_v12  ;;  %v5882_v12 = vld [vmem:[%s7756_s4 + $0x860] ss:$12 sps:$4 sm:$0xff]  }
 0x1ee   :  { %3826 = vmatpush1.bf16.msra.mxu0 %v5834_v25  ;;  %v5879_v25 = vld [vmem:[%s7756_s4 + $0x900] ss:$12 sps:$4 sm:$0xff]  }
 0x1ef   :  { %4087 = vmatmul.mubr.bf16.vlgmr.msra.gmra.mrb[36].mxu1 %v7015_v9  ;;  %3827 = vmatprep.subr.bf16.mxu0 %v5841_v57  ;;  %v5847_v9 = vld [vmem:[%s7756_s4 + $0x6f8] ss:$12 sps:$4 sm:$0xff]   ;;  %v7441_v57 = vpack.c.bf16 %v1244_v7, %v1244_v7  ;;  %v5934_v7 = vld [vmem:[%s7756_s4 + $0xa08] ss:$12 sps:$4 sm:$0xff]  }
 0x1f0   :  { %5144 = vmatpush3.bf16.msra.mxu1 %v5838_v26  ;;  %4126 = vmatprep.mubr.bf16.mxu1 %v7022_v53  ;;  %v5851_v53 = vld [vmem:[%s7756_s4 + $0x874] ss:$12 sps:$4 sm:$0xff]   ;;  %v5886_v26 = vld [vmem:[%s7756_s4 + $0x91c] ss:$12 sps:$4 sm:$0xff]  }
 0x1f1   :  { %5145 = vmatprep.subr.bf16.mxu1 %v5842_v27  ;;  %v7448_v27 = vpack.c.bf16 %v1247_v24, %v1247_v24  ;;  %v5946_v24 = vld [vmem:[%s7756_s4 + $0xa3c] ss:$12 sps:$4 sm:$0xff]  }
 0x1f2   :  { %3828 = vmatpush1.bf16.msra.mxu0 %v5839_v30  ;;  %v5883_v30 = vld [vmem:[%s7756_s4 + $0x7a0] ss:$12 sps:$4 sm:$0xff]  }
 0x1f3   :  { %3829 = vmatprep.subr.bf16.mxu0 %v5846_v6  ;;  %v5891_v6 = vld [vmem:[%s7756_s4 + $0x934] ss:$12 sps:$4 sm:$0xff]  }
 0x1f4   :  { %5146 = vmatpush3.bf16.msra.mxu1 %v5843_v36  ;;  %v5888_v36 = vld [vmem:[%s7756_s4 + $0x7b8] ss:$12 sps:$4 sm:$0xff]  }
 0x1f5   :  { %5147 = vmatprep.subr.bf16.mxu1 %v5847_v9  ;;  %v5889_v9 = vld [vmem:[%s7756_s4 + $0x930] ss:$12 sps:$4 sm:$0xff]  }
 0x1f6   :  { %3830 = vmatpush1.bf16.msra.mxu0 %v5844_v40  ;;  %v5893_v40 = vld [vmem:[%s7756_s4 + $0x7d0] ss:$12 sps:$4 sm:$0xff]  }
 0x1f7   :  { %3831 = vmatprep.subr.bf16.mxu0 %v5851_v53  ;;  %v5897_v53 = vld [vmem:[%s7756_s4 + $0x8a8] ss:$12 sps:$4 sm:$0xff]  }
 0x1f8   :  { %5148 = vmatpush3.bf16.msra.mxu1 %v5848_v1  ;;  %v5894_v1 = vld [vmem:[%s7756_s4 + $0x948] ss:$12 sps:$4 sm:$0xff]  }
 0x1f9   :  { %5149 = vmatprep.subr.bf16.mxu1 %v5852_v42  ;;  %v5901_v42 = vld [vmem:[%s7756_s4 + $0x964] ss:$12 sps:$4 sm:$0xff]  }
 0x1fa   :  { %3832 = vmatpush1.bf16.msra.mxu0 %v5849_v16  ;;  %v5898_v16 = vld [vmem:[%s7756_s4 + $0x7e8] ss:$12 sps:$4 sm:$0xff]  }
 0x1fb   :  { %3833 = vmatprep.subr.bf16.mxu0 %v5856_v43  ;;  %v5902_v43 = vld [vmem:[%s7756_s4 + $0x8c0] ss:$12 sps:$4 sm:$0xff]  }
 0x1fc   :  { %5150 = vmatpush3.bf16.msra.mxu1 %v5853_v44  ;;  %v5899_v44 = vld [vmem:[%s7756_s4 + $0x960] ss:$12 sps:$4 sm:$0xff]  }
 0x1fd   :  { %5151 = vmatprep.subr.bf16.mxu1 %v5857_v45  ;;  %v5906_v45 = vld [vmem:[%s7756_s4 + $0x97c] ss:$12 sps:$4 sm:$0xff]  }
 0x1fe   :  { %3834 = vmatpush1.bf16.msra.mxu0 %v5854_v46  ;;  %v5903_v46 = vld [vmem:[%s7756_s4 + $0x800] ss:$12 sps:$4 sm:$0xff]  }
 0x1ff   :  { %3835 = vmatprep.subr.bf16.mxu0 %v5861_v49  ;;  %v5904_v49 = vld [vmem:[%s7756_s4 + $0x978] ss:$12 sps:$4 sm:$0xff]  }
 0x200   :  { %5152 = vmatpush3.bf16.msra.mxu1 %v5858_v31  ;;  %v5908_v31 = vld [vmem:[%s7756_s4 + $0x818] ss:$12 sps:$4 sm:$0xff]  }
 0x201   :  { %5153 = vmatprep.subr.bf16.mxu1 %v5862_v18  ;;  %v5912_v18 = vld [vmem:[%s7756_s4 + $0x8f0] ss:$12 sps:$4 sm:$0xff]  }
 0x202   :  { %3836 = vmatpush1.bf16.msra.mxu0 %v5859_v54  ;;  %v5909_v54 = vld [vmem:[%s7756_s4 + $0x990] ss:$12 sps:$4 sm:$0xff]  }
 0x203   :  { %3837 = vmatprep.subr.bf16.mxu0 %v5866_v14  ;;  %v5913_v14 = vld [vmem:[%s7756_s4 + $0x830] ss:$12 sps:$4 sm:$0xff]  }
 0x204   :  { %5154 = vmatpush3.bf16.msra.mxu1 %v5863_v58  ;;  %v5914_v58 = vld [vmem:[%s7756_s4 + $0x9a8] ss:$12 sps:$4 sm:$0xff]  }
 0x205   :  { %5155 = vmatprep.subr.bf16.mxu1 %v5867_v41  ;;  %v5921_v41 = vld [vmem:[%s7756_s4 + $0x9c4] ss:$12 sps:$4 sm:$0xff]  }
 0x206   :  { %3838 = vmatpush1.bf16.msra.mxu0 %v5864_v56  ;;  %v5918_v56 = vld [vmem:[%s7756_s4 + $0x908] ss:$12 sps:$4 sm:$0xff]  }
 0x207   :  { %3839 = vmatprep.subr.bf16.mxu0 %v5871_v63  ;;  %v5919_v63 = vld [vmem:[%s7756_s4 + $0x9c0] ss:$12 sps:$4 sm:$0xff]  }
 0x208   :  { %5156 = vmatpush3.bf16.msra.mxu1 %v5868_v62  ;;  %v5923_v62 = vld [vmem:[%s7756_s4 + $0x920] ss:$12 sps:$4 sm:$0xff]  }
 0x209   :  { %5157 = vmatprep.subr.bf16.mxu1 %v5872_v0  ;;  %v5927_v0 = vld [vmem:[%s7756_s4 + $0x9f8] ss:$12 sps:$4 sm:$0xff]  }
 0x20a   :  { %3840 = vmatpush1.bf16.msra.mxu0 %v5869_v3  ;;  %v5924_v3 = vld [vmem:[%s7756_s4 + $0x9d8] ss:$12 sps:$4 sm:$0xff]  }
 0x20b   :  { %3841 = vmatprep.subr.bf16.mxu0 %v5876_v11  ;;  %v5932_v11 = vld [vmem:[%s7756_s4 + $0xa10] ss:$12 sps:$4 sm:$0xff]  }
 0x20c   :  { %5158 = vmatpush3.bf16.msra.mxu1 %v5873_v15  ;;  %v5933_v15 = vld [vmem:[%s7756_s4 + $0x950] ss:$12 sps:$4 sm:$0xff]  }
 0x20d   :  { %5165 = vmatprep.subr.bf16.mxu1 %v5877_v20  ;;  %v229_v20 = vrot.slane %v6868_v34, %v196_v39  ;;  %v5942_v34 = vld [vmem:[%s7756_s4 + $0xa40] ss:$12 sps:$4 sm:$0xff]  }
 0x20e   :  { %3842 = vmatpush1.bf16.msra.mxu0 %v5874_v21  ;;  %v5937_v21 = vld [vmem:[%s7756_s4 + $0xa28] ss:$12 sps:$4 sm:$0xff]  }
 0x20f   :  { %4127 = vmatmul.mubr.bf16.vlgmr.msra.gmra.mrb[40].mxu1 %v7226_v48  ;;  %3852 = vmatprep.subr.bf16.mxu0 %v5881_v22  ;;  %v5887_v48 = vld [vmem:[%s7756_s4 + $0x878] ss:$12 sps:$4 sm:$0xff]   ;;  %v1142_v39 = vadd.f32 %v6903_v2, %v229_v20  ;;  %v5943_v2 = vld [vmem:[%s7756_s4 + $0x980] ss:$12 sps:$4 sm:$0xff]  }
 0x210   :  { %5166 = vmatpush3.bf16.msra.mxu1 %v5878_v23  ;;  %4166 = vmatprep.mubr.bf16.mxu1 %v7233_v50  ;;  %v5884_v50 = vld [vmem:[%s7756_s4 + $0x918] ss:$12 sps:$4 sm:$0xff]   ;;  %v5939_v23 = vld [vmem:[%s7756_s4 + $0xa20] ss:$12 sps:$4 sm:$0xff]  }
 0x211   :  { %3844 = vmatmul.mubr.bf16.vlgmr.msra.gmra.mrb[16].mxu0 %v7441_v57  ;;  %5167 = vmatprep.subr.bf16.mxu1 %v5882_v12  ;;  %v5941_v22 = vld [vmem:[%s7756_s4 + $0xa24] ss:$12 sps:$4 sm:$0xff]   ;;  %v1215_v12 = vmin.f32 %v1142_v39, 0.0 }
 0x212   :  { %3853 = vmatpush1.bf16.msra.mxu0 %v5879_v25  ;;  %3884 = vmatprep.mubr.bf16.mxu0 %v7448_v27  ;;  %v5947_v25 = vld [vmem:[%s7756_s4 + $0xa58] ss:$12 sps:$4 sm:$0xff]  }
 0x213   :  { %3854 = vmatprep.subr.bf16.mxu0 %v5886_v26 }
 0x214   :  { %5168 = vmatpush3.bf16.msra.mxu1 %v5883_v30 }
 0x215   :  { %5169 = vmatprep.subr.bf16.mxu1 %v5887_v48  ;;  %v5948_v48 = vld [vmem:[%s7756_s4 + $0x998] ss:$12 sps:$4 sm:$0xff]  }
 0x216   :  { %3855 = vmatpush1.bf16.msra.mxu0 %v5884_v50 }
 0x217   :  { %3856 = vmatprep.subr.bf16.mxu0 %v5891_v6  ;;  %v1200_v6 = vmax.f32 %v1142_v39, 0.0  ;;  %v5973_v39 = vld [vmem:[%s7758_s6 + $0x70] sm:$0xff]  }
 0x218   :  { %5170 = vmatpush3.bf16.msra.mxu1 %v5888_v36  ;;  %v1231_v36 = vmul.f32 %v6653_v13, %v1215_v12  ;;  %v5953_v13 = vld [vmem:[%s7756_s4 + $0x9b0] ss:$12 sps:$4 sm:$0xff]  }
 0x219   :  { %5171 = vmatprep.subr.bf16.mxu1 %v5892_v37  ;;  %v5952_v37 = vld [vmem:[%s7756_s4 + $0xa70] ss:$12 sps:$4 sm:$0xff]  }
 0x21a   :  { %3857 = vmatpush1.bf16.msra.mxu0 %v5889_v9 }
 0x21b   :  { %3858 = vmatprep.subr.bf16.mxu0 %v5896_v38  ;;  %v5949_v38 = vld [vmem:[%s7756_s4 + $0xa50] ss:$12 sps:$4 sm:$0xff]  }
 0x21c   :  { %5172 = vmatpush3.bf16.msra.mxu1 %v5893_v40  ;;  %v5956_v40 = vld [vmem:[%s7756_s4 + $0xa6c] ss:$12 sps:$4 sm:$0xff]  }
 0x21d   :  { %5173 = vmatprep.subr.bf16.mxu1 %v5897_v53  ;;  %v1246_v53 = vadd.f32 %v1231_v36, %v1200_v6 }
 0x21e   :  { %3859 = vmatpush1.bf16.msra.mxu0 %v5894_v1  ;;  %v5954_v1 = vld [vmem:[%s7756_s4 + $0xa68] ss:$12 sps:$4 sm:$0xff]  }
 0x21f   :  { %3860 = vmatprep.subr.bf16.mxu0 %v5901_v42  ;;  %v5957_v42 = vld [vmem:[%s7756_s4 + $0xa88] ss:$12 sps:$4 sm:$0xff]  }
 0x220   :  { %5174 = vmatpush3.bf16.msra.mxu1 %v5898_v16  ;;  %v1262_v16 = vpack.c.bf16 %v1246_v53, %v1246_v53 }
 0x221   :  { %5175 = vmatprep.subr.bf16.mxu1 %v5902_v43  ;;  %v5958_v43 = vld [vmem:[%s7756_s4 + $0xaa0] ss:$12 sps:$4 sm:$0xff]  }
 0x222   :  { %3861 = vmatpush1.bf16.msra.mxu0 %v5899_v44  ;;  %v5959_v44 = vld [vmem:[%s7756_s4 + $0xab8] ss:$12 sps:$4 sm:$0xff]  }
 0x223   :  { %3862 = vmatprep.subr.bf16.mxu0 %v5906_v45  ;;  %v5960_v45 = vld [vmem:[%s7756_s4 + $0xad0] ss:$12 sps:$4 sm:$0xff]  }
 0x224   :  { %5176 = vmatpush3.bf16.msra.mxu1 %v5903_v46 }
 0x225   :  { %5177 = vmatprep.subr.bf16.mxu1 %v5907_v47 }
 0x226   :  { %3863 = vmatpush1.bf16.msra.mxu0 %v5904_v49 }
 0x227   :  { %3864 = vmatprep.subr.bf16.mxu0 %v5911_v51 }
 0x228   :  { %5178 = vmatpush3.bf16.msra.mxu1 %v5908_v31 }
 0x229   :  { %5179 = vmatprep.subr.bf16.mxu1 %v5912_v18  ;;  %v7660_v18 = vld [vmem:[%s7757_s5] sm:$0x7]  ;;  %s4670_s5 = sld [smem:[#allocation2 + $0x1]] }
 0x22a   :  { %3865 = vmatpush1.bf16.msra.mxu0 %v5909_v54  ;;  %v1742_v54 = vrot.slane %v7660_v18, %v6640_v5  ;;  %v5964_v5 = vld [vmem:[%s7758_s6 + $0x8] sm:$0xff]  }
 0x22b   :  { %3866 = vmatprep.subr.bf16.mxu0 %v5916_v55 }
 0x22c   :  { %5180 = vmatpush3.bf16.msra.mxu1 %v5913_v14 }
 0x22d   :  { %5187 = vmatprep.subr.bf16.mxu1 %v5917_v32 }
 0x22e   :  { %3867 = vmatpush1.bf16.msra.mxu0 %v5914_v58 }
 0x22f   :  { %4167 = vmatmul.mubr.bf16.vlgmr.msra.gmra.mrb[44].mxu1 %v7441_v57  ;;  %3868 = vmatprep.subr.bf16.mxu0 %v5921_v41  ;;  %v5944_v57 = vld [vmem:[%s7756_s4 + $0xa38] ss:$12 sps:$4 sm:$0xff]  }
 0x230   :  { %5188 = vmatpush3.bf16.msra.mxu1 %v5918_v56  ;;  %4206 = vmatprep.mubr.bf16.mxu1 %v7448_v27  ;;  %v5951_v27 = vld [vmem:[%s7756_s4 + $0xa54] ss:$12 sps:$4 sm:$0xff]  }
 0x231   :  { %5189 = vmatprep.subr.bf16.mxu1 %v5922_v60  ;;  %v5961_v60 = vld [vmem:[%s7758_s6 + $0x40] sm:$0xff]  }
 0x232   :  { %3869 = vmatpush1.bf16.msra.mxu0 %v5919_v63  ;;  %v5962_v63 = vld [vmem:[%s7758_s6] sm:$0xff]  }
 0x233   :  { %3870 = vmatprep.subr.bf16.mxu0 %v5926_v61  ;;  %v5963_v61 = vld [vmem:[%s7758_s6 + $0x48] sm:$0xff]  }
 0x234   :  { %5190 = vmatpush3.bf16.msra.mxu1 %v5923_v62  ;;  %v5965_v62 = vld [vmem:[%s7758_s6 + $0x50] sm:$0xff]  }
 0x235   :  { %5191 = vmatprep.subr.bf16.mxu1 %v5927_v0  ;;  %v5966_v0 = vld [vmem:[%s7758_s6 + $0x10] sm:$0xff]  }
 0x236   :  { %3871 = vmatpush1.bf16.msra.mxu0 %v5924_v3  ;;  %v5967_v3 = vld [vmem:[%s7758_s6 + $0x58] sm:$0xff]  }
 0x237   :  { %3872 = vmatprep.subr.bf16.mxu0 %v5931_v8  ;;  %v5968_v8 = vld [vmem:[%s7758_s6 + $0x18] sm:$0xff]  }
 0x238   :  { %5192 = vmatpush3.bf16.msra.mxu1 %v5928_v10  ;;  %v5969_v10 = vld [vmem:[%s7758_s6 + $0x60] sm:$0xff]  }
 0x239   :  { %5193 = vmatprep.subr.bf16.mxu1 %v5932_v11  ;;  %v5970_v11 = vld [vmem:[%s7758_s6 + $0x20] sm:$0xff]  }
 0x23a   :  { %3873 = vmatpush1.bf16.msra.mxu0 %v5929_v52 }
 0x23b   :  { %3874 = vmatprep.subr.bf16.mxu0 %v5936_v28 }
 0x23c   :  { %5194 = vmatpush3.bf16.msra.mxu1 %v5933_v15 }
 0x23d   :  { %5195 = vmatprep.subr.bf16.mxu1 %v5937_v21  ;;  %v5971_v21 = vld [vmem:[%s7758_s6 + $0x68] sm:$0xff]  }
 0x23e   :  { %3875 = vmatpush1.bf16.msra.mxu0 %v5934_v7 }
 0x23f   :  { %3876 = vmatprep.subr.bf16.mxu0 %v5941_v22  ;;  %v5972_v22 = vld [vmem:[%s7758_s6 + $0x28] sm:$0xff]  }
 0x240   :  { %5196 = vmatpush3.bf16.msra.mxu1 %v5938_v4 }
 0x241   :  { %5197 = vmatprep.subr.bf16.mxu1 %v5942_v34  ;;  %v5974_v34 = vld [vmem:[%s7758_s6 + $0x30] sm:$0xff]  }
 0x242   :  { %3877 = vmatpush1.bf16.msra.mxu0 %v5939_v23  ;;  %v7611_v26 = vpop.f32.mrb[20].mxu1  ;;  %v5975_v23 = vld [vmem:[%s7758_s6 + $0x78] sm:$0xff]  }
 0x243   :  { %3878 = vmatprep.subr.bf16.mxu0 %v5946_v24  ;;  %v7616_v30 = vpop.f32.mrb[21].mxu1  ;;  %v5976_v24 = vld [vmem:[%s7758_s6 + $0x38] sm:$0xff]  }
 0x244   :  { %5198 = vmatpush3.bf16.msra.mxu1 %v5943_v2  ;;  %v3931_v50 = vpop.f32.mrb[22].mxu1 }
 0x245   :  { %5199 = vmatprep.subr.bf16.mxu1 %v5947_v25  ;;  %v3932_v9 = vpop.f32.mrb[23].mxu1 }
 0x246   :  { %3879 = vmatpush1.bf16.msra.mxu0 %v5944_v57 }
 0x247   :  { %3880 = vmatprep.subr.bf16.mxu0 %v5951_v27 }
 0x248   :  { %5200 = vmatpush3.bf16.msra.mxu1 %v5948_v48 }
 0x249   :  { %5201 = vmatprep.subr.bf16.mxu1 %v5952_v37 }
 0x24a   :  { %3881 = vmatpush1.bf16.msra.mxu0 %v5949_v38 }
 0x24b   :  { %3882 = vmatprep.subr.bf16.mxu0 %v5956_v40 }
 0x24c   :  { %5202 = vmatpush3.bf16.msra.mxu1 %v5953_v13 }
 0x24d   :  { %5263 = vmatprep.subr.bf16.mxu1 %v5999_v35 }
 0x24e   :  { %3883 = vmatpush1.bf16.msra.mxu0 %v5954_v1 }
 0x24f   :  { %4207 = vmatmul.mubr.bf16.vlgmr.msra.gmra.mrb[48].mxu1 %v1262_v16 }
 0x250   :  { %5264 = vmatpush3.bf16.msra.mxu1 %v5957_v42  ;;  %5271 = vmatprep.mubr.msk.bf16.mxu1 %vm6000_vm0, %v5999_v35 }
 0x251   :  { %3885 = vmatmul.mubr.bf16.vlgmr.msra.gmra.mrb[16].mxu0 %v1262_v16  ;;  %5265 = vmatprep.subr.bf16.mxu1 %v5999_v35 }
 0x254   :  { %5266 = vmatpush3.bf16.msra.mxu1 %v5958_v43  ;;  %v1734_v43 = vrot.slane %v7660_v18, %v6656_v17 }
 0x255   :  { %5267 = vmatprep.subr.bf16.mxu1 %v5999_v35 }
 0x258   :  { %5268 = vmatpush3.bf16.msra.mxu1 %v5959_v44  ;;  %v1738_v44 = vrot.slane %v7660_v18, %v6659_v19  ;;  %v4260_v19 = vstv %s4670_s5 }
 0x259   :  { %5269 = vmatprep.subr.bf16.mxu1 %v5999_v35 }
 0x25c   :  { %5270 = vmatpush3.bf16.msra.mxu1 %v5960_v45 }
 0x25d   :  { %5214 = vmatprep.subr.bf16.mxu1 %v5961_v60 }
 0x25f   :  { %5272 = vmatmul.mubr.msk.bf16.vlgmr.msra.gmra.mrb[52].mxu1 %vm3602_vm1, %v6895_v59 }
 0x260   :  { %5215 = vmatpush3.bf16.msra.mxu1 %v5962_v63 }
 0x261   :  { %5216 = vmatprep.subr.bf16.mxu1 %v5963_v61 }
 0x262   :  { %v5071_v46 = vpop.f32.mrb[24].mxu1 }
 0x263   :  { %v5072_v47 = vpop.f32.mrb[25].mxu1 }
 0x264   :  { %v5073_v49 = vadd.f32 %v5072_v47, %v5071_v46  ;;  %v5074_v51 = vpop.f32.mrb[26].mxu1  ;;  %5217 = vmatpush3.bf16.msra.mxu1 %v5964_v5  ;;  %v3641_v46 = vadd.f32 %v7330_v33, %v1734_v43 }
 0x265   :  { %v5075_v31 = vpop.f32.mrb[27].mxu1  ;;  %5218 = vmatprep.subr.bf16.mxu1 %v5965_v62 }
 0x266   :  { %v3969_v32 = vadd.f32 %v5073_v49, %v1742_v54  ;;  %v3643_v49 = vadd.f32 %v7336_v29, %v1738_v44 }
 0x268   :  { %5219 = vmatpush3.bf16.msra.mxu1 %v5966_v0 }
 0x269   :  { %5220 = vmatprep.subr.bf16.mxu1 %v5967_v3 }
 0x26c   :  { %5221 = vmatpush3.bf16.msra.mxu1 %v5968_v8  ;;  %v5977_v8 = vld [vmem:[%s7758_s6 + $0x80] sm:$0xff]  }
 0x26d   :  { %5222 = vmatprep.subr.bf16.mxu1 %v5969_v10 }
 0x270   :  { %5223 = vmatpush3.bf16.msra.mxu1 %v5970_v11 }
 0x271   :  { %5224 = vmatprep.subr.bf16.mxu1 %v5971_v21  ;;  %v5980_v21 = vld [vmem:[%s7758_s6 + $0x98] sm:$0xff]  }
 0x274   :  { %5225 = vmatpush3.bf16.msra.mxu1 %v5972_v22  ;;  %v5981_v22 = vld [vmem:[%s7758_s6 + $0xa0] sm:$0xff]  }
 0x275   :  { %5226 = vmatprep.subr.bf16.mxu1 %v5973_v39 }
 0x278   :  { %5227 = vmatpush3.bf16.msra.mxu1 %v5974_v34  ;;  %v5982_v34 = vld [vmem:[%s7758_s6 + $0xa8] sm:$0xff]  }
 0x279   :  { %5228 = vmatprep.subr.bf16.mxu1 %v5975_v23 }
 0x27c   :  { %5229 = vmatpush3.bf16.msra.mxu1 %v5976_v24 }
 0x27d   :  { %5275 = vmatprep.subr.bf16.mxu1 %v5999_v35 }
 0x282   :  { %v5093_v55 = vpop.f32.mrb[28].mxu1 }
 0x283   :  { %v5094_v14 = vpop.f32.mrb[29].mxu1 }
 0x284   :  { %v5095_v58 = vadd.f32 %v5094_v14, %v5093_v55  ;;  %v5096_v41 = vpop.f32.mrb[30].mxu1 }
 0x285   :  { %v5097_v56 = vpop.f32.mrb[31].mxu1 }
 0x286   :  { %v4009_v59 = vadd.f32 %v5095_v58, %v3969_v32 }
 0x2a2   :  { %v5115_v52 = vpop.f32.mrb[32].mxu1 }
 0x2a3   :  { %v5116_v28 = vpop.f32.mrb[33].mxu1 }
 0x2a4   :  { %v5117_v15 = vadd.f32 %v5116_v28, %v5115_v52  ;;  %v5118_v20 = vpop.f32.mrb[34].mxu1  ;;  %v5978_v28 = vld [vmem:[%s7758_s6 + $0x88] sm:$0xff]  }
 0x2a5   :  { %v5119_v7 = vpop.f32.mrb[35].mxu1  ;;  %v5979_v20 = vld [vmem:[%s7758_s6 + $0x90] sm:$0xff]  }
 0x2a6   :  { %v4049_v4 = vadd.f32 %v5117_v15, %v4009_v59 }
 0x2c2   :  { %v5137_v2 = vpop.f32.mrb[36].mxu1 }
 0x2c3   :  { %v5138_v12 = vpop.f32.mrb[37].mxu1 }
 0x2c4   :  { %v5139_v25 = vadd.f32 %v5138_v12, %v5137_v2  ;;  %v5140_v57 = vpop.f32.mrb[38].mxu1 }
 0x2c5   :  { %v5141_v27 = vpop.f32.mrb[39].mxu1 }
 0x2c6   :  { %v4089_v48 = vadd.f32 %v5139_v25, %v4049_v4 }
 0x2e2   :  { %v5159_v50 = vpop.f32.mrb[40].mxu1 }
 0x2e3   :  { %v5160_v6 = vpop.f32.mrb[41].mxu1 }
 0x2e4   :  { %v5161_v36 = vadd.f32 %v5160_v6, %v5159_v50  ;;  %v5162_v37 = vpop.f32.mrb[42].mxu1 }
 0x2e5   :  { %v5163_v9 = vpop.f32.mrb[43].mxu1 }
 0x2e6   :  { %v4129_v38 = vadd.f32 %v5161_v36, %v4089_v48  ;;  %v5022_v48 = vld [vmem:[%s7759_s7] ss:$0 sm:$0xff]  ;;  %v4540_v9 = vstv %s5021_s13 }
 0x302   :  { %v5181_v40 = vpop.f32.mrb[44].mxu1 }
 0x303   :  { %v5182_v13 = vpop.f32.mrb[45].mxu1 }
 0x304   :  { %v5183_v53 = vadd.f32 %v5182_v13, %v5181_v40  ;;  %v5184_v1 = vpop.f32.mrb[46].mxu1 }
 0x305   :  { %v5185_v42 = vpop.f32.mrb[47].mxu1 }
 0x306   :  { %v4169_v16 = vadd.f32 %v5183_v53, %v4129_v38 }
 0x322   :  { %v5203_v45 = vpop.f32.mrb[48].mxu1 }
 0x323   :  { %v5204_v47 = vpop.f32.mrb[49].mxu1 }
 0x324   :  { %v5205_v51 = vadd.f32 %v5204_v47, %v5203_v45  ;;  %v3886_v31 = vpop.f32.mrb[16].mxu0  ;;  %v5206_v54 = vpop.f32.mrb[50].mxu1 }
 0x325   :  { %v5292_v55 = vadd.f32 %v3886_v31, %v3641_v46  ;;  %v3888_v14 = vpop.f32.mrb[17].mxu0  ;;  %v5207_v32 = vpop.f32.mrb[51].mxu1 }
 0x326   :  { %v5295_v58 = vadd.f32 %v3888_v14, %v3643_v49  ;;  %v3890_v41 = vpop.f32.mrb[18].mxu0  ;;  %v4209_v56 = vadd.f32 %v5205_v51, %v4169_v16 }
 0x327   :  { %v5293_v17 = vadd.f32 %v5292_v55, %v7611_v26  ;;  %v3891_v59 = vpop.f32.mrb[19].mxu0 }
 0x328   :  { %v5296_v18 = vadd.f32 %v5295_v58, %v7616_v30 }
 0x329   :  { %v4257_v60 = vmin.f32 %v5293_v17, 0.0  ;;  %v4254_v63 = vmax.f32 %v5293_v17, 0.0 }
 0x32a   :  { %v4258_v33 = vmin.f32 %v5296_v18, 0.0  ;;  %v4255_v29 = vmax.f32 %v5296_v18, 0.0 }
 0x32b   :  { %v4261_v61 = vmul.f32 %v4260_v19, %v4257_v60 }
 0x32c   :  { %v4262_v5 = vmul.f32 %v4260_v19, %v4258_v33 }
 0x32d   :  { %v4264_v62 = vadd.f32 %v4261_v61, %v4254_v63 }
 0x32e   :  { %v4265_v0 = vadd.f32 %v4262_v5, %v4255_v29 }
 0x32f   :  { %v4268_v10 = vpack.c.bf16 %v4264_v62, %v4264_v62 }
 0x330   :  { %v4269_v3 = vpack.c.bf16 %v4265_v0, %v4265_v0 }
 0x332   :  { %v4248_v11 = vpop.f32.mrb[52].mxu1  ;;  %4490 = vmatprep.mubr.bf16.mxu1 %v4269_v3 }
 0x333   :  { %v4249_v26 = vadd.f32 %v4248_v11, %v4209_v56  ;;  %v5273_v52 = vpop.f32.mrb[53].mxu1  ;;  %4491 = vmatmul.mubr.bf16.vlgmr.msra.gmra.mrb[56].mxu1 %v4268_v10 }
 0x334   :  { %5276 = vmatpush3.bf16.msra.mxu1 %v5977_v8  ;;  %v4251_v30 = vpop.f32.mrb[54].mxu1  ;;  %5287 = vmatprep.mubr.msk.bf16.mxu1 %vm6000_vm0, %v5999_v35 }
 0x335   :  { %v5274_v15 = vpop.f32.mrb[55].mxu1  ;;  %5277 = vmatprep.subr.bf16.mxu1 %v5999_v35  ;;  %v4259_v7 = vmin.f32 %v4249_v26, 0.0  ;;  %v4256_v39 = vmax.f32 %v4249_v26, 0.0 }
 0x337   :  { %v4263_v4 = vmul.f32 %v4260_v19, %v4259_v7 }
 0x338   :  { %5278 = vmatpush3.bf16.msra.mxu1 %v5978_v28 }
 0x339   :  { %5279 = vmatprep.subr.bf16.mxu1 %v5999_v35  ;;  %v4266_v23 = vadd.f32 %v4263_v4, %v4256_v39 }
 0x33b   :  { %v4270_v24 = vpack.c.bf16 %v4266_v23, %v4266_v23 }
 0x33c   :  { %5280 = vmatpush3.bf16.msra.mxu1 %v5979_v20 }
 0x33d   :  { %5281 = vmatprep.subr.bf16.mxu1 %v5999_v35 }
 0x340   :  { %5282 = vmatpush3.bf16.msra.mxu1 %v5980_v21 }
 0x341   :  { %5283 = vmatprep.subr.bf16.mxu1 %v5999_v35 }
 0x344   :  { %5284 = vmatpush3.bf16.msra.mxu1 %v5981_v22 }
 0x345   :  { %5285 = vmatprep.subr.bf16.mxu1 %v5999_v35 }
 0x348   :  { %5286 = vmatpush3.bf16.msra.mxu1 %v5982_v34 }
 0x34b   :  { %5288 = vmatmul.mubr.msk.bf16.vlgmr.msra.gmra.mrb[60].mxu1 %vm4454_vm2, %v4270_v24 }
 0x406   :  { %v5230_v2 = vpop.f32.mrb[56].mxu1 }
 0x407   :  { %v5231_v12 = vpop.f32.mrb[57].mxu1 }
 0x408   :  { %v5232_v25 = vadd.f32 %v5231_v12, %v5230_v2  ;;  %v5233_v57 = vpop.f32.mrb[58].mxu1 }
 0x409   :  { %v5234_v27 = vpop.f32.mrb[59].mxu1 }
 0x40a   :  { %v4493_v50 = vadd.f32 %v5232_v25, %v5022_v48 }
 0x41e   :  { %v4532_v6 = vpop.f32.mrb[60].mxu1 }
 0x41f   :  { %v4533_v36 = vadd.f32 %v4532_v6, %v4493_v50  ;;  %v5289_v37 = vpop.f32.mrb[61].mxu1 }
 0x420   :  { %v4535_v35 = vpop.f32.mrb[62].mxu1 }
 0x421   :  { %v4539_v38 = vmin.f32 %v4533_v36, 0.0  ;;  %v5290_v40 = vpop.f32.mrb[63].mxu1  ;;  %v4538_v13 = vmax.f32 %v4533_v36, 0.0 }
 0x423   :  { %v4541_v53 = vmul.f32 %v4540_v9, %v4539_v38 }
 0x425   :  { %v4542_v1 = vadd.f32 %v4541_v53, %v4538_v13 }
 0x427   :  { %4544 = vst.msk [vmem:[%s7760_s8] sm:$0xff] %vm4543_vm3, %v4542_v1 }
 0x428   :  { %4549 = vsyncpa [#allocation3], 1 }

</bundles_post_ra>
